<compile_context>
chip_gen: v5e
topology: v5e:2x2
jax: 0.10.0
libtpu: 0.0.40
codegen_flags: <defaults>
</compile_context>

<pallas_src>
import jax
import jax.numpy as jnp
from jax.experimental import pallas as pl
from jax.experimental.pallas import tpu as pltpu


def _round_up(a: int, m: int) -> int:
    return -(-a // m) * m


def _sobel_kernel(dpad_ref, o_ref):
    """dpad_ref: (H+2, W+2, BB) f32 padded difference, batch in lanes.
    o_ref: (1, W, BB) f32 per-lane partial sums of gx8^2 + gy8^2."""
    Hp2, Wp2, _ = dpad_ref.shape
    H, W = Hp2 - 2, Wp2 - 2

    d = dpad_ref[...]                       # (H+2, W+2, BB), f32

    # Column (W / sublane) stage of the separable Sobel.
    c0 = d[:, 0:W, :]
    c1 = d[:, 1:W + 1, :]
    c2 = d[:, 2:W + 2, :]
    h1 = c0 - c2                            # (H+2, W, BB)
    h2 = c0 + 2.0 * c1 + c2

    # Row (H / outer-dim) stage: 8*gx and 8*gy (the /8 is deferred to wrapper).
    gx8 = h1[0:H] + 2.0 * h1[1:H + 1] + h1[2:H + 2]     # (H, W, BB)
    gy8 = h2[0:H] - h2[2:H + 2]

    sq = gx8 * gx8 + gy8 * gy8

    # Reduce over H only (outer-dim vreg adds, no cross-lane XLU reduce);
    # store a lane-dense full block of per-(w, lane) partial sums.
    psum = jnp.sum(sq, axis=0)              # (W, BB)
    o_ref[...] = psum[None]


def high_freq_loss(x: jax.Array, y: jax.Array, *, block_lanes=None) -> jax.Array:
    """x, y: (N, C, H, W). Returns scalar mean(gx^2 + gy^2), matching HighFreqLoss."""
    N, C, H, W = x.shape
    B = N * C

    # ---- block sizing (padded-VMEM-footprint aware) -------------------------
    if block_lanes is None:
        # Live set per block (f32): double-buffered input tile + ~5 stencil
        # intermediates, each roughly (H+2) * roundup(W+2, 8) * BB * 4 bytes.
        sub_w = _round_up(W + 2, 8)
        per_lane_bytes = 7 * (H + 2) * sub_w * 4
        budget = 8 << 20                                    # ~8 MiB live set
        block_lanes = max(128, min(512, (budget // per_lane_bytes) // 128 * 128))
        # Prefer >= 2 grid blocks when the batch allows, so the "parallel"
        # grid axis can feed both TensorCores on v7x.
        b128 = _round_up(B, 128)
        if b128 >= 2 * 128:
            block_lanes = min(block_lanes, _round_up(b128 // 2, 128))
    block_lanes = _round_up(int(block_lanes), 128)
    block_lanes = min(block_lanes, _round_up(B, 128))

    b_pad = _round_up(B, block_lanes)
    num_blocks = b_pad // block_lanes

    # ---- single fused XLA prologue ------------------------------------------
    # f32 difference (avoids bf16 cancellation), batch-last transpose, 1-px
    # zero halo, and zero lane-padding of the batch (zeros contribute 0).
    d = (x.astype(jnp.float32) - y.astype(jnp.float32)).reshape(B, H, W)
    d = jnp.transpose(d, (1, 2, 0))                         # (H, W, B)
    dpad = jnp.pad(d, ((1, 1), (1, 1), (0, b_pad - B)))     # (H+2, W+2, b_pad)

    partials = pl.pallas_call(
        _sobel_kernel,
        out_shape=jax.ShapeDtypeStruct((num_blocks, W, block_lanes), jnp.float32),
        grid_spec=pltpu.PrefetchScalarGridSpec(
            num_scalar_prefetch=0,
            grid=(num_blocks,),
            in_specs=[
                pl.BlockSpec((H + 2, W + 2, block_lanes), lambda b: (0, 0, b)),
            ],
            out_specs=pl.BlockSpec((1, W, block_lanes), lambda b: (b, 0, 0)),
        ),
        compiler_params=pltpu.CompilerParams(
            dimension_semantics=("parallel",),   # independent per-block partials
            vmem_limit_bytes=32 * 1024 * 1024,   # v5e default scoped limit is 16 MiB
        ),
    )(dpad)

    # Tiny final reduce + deferred (1/8)^2 of both filters + mean.
    scale = 1.0 / (64.0 * N * C * H * W)
    return jnp.sum(partials) * scale


def high_freq_loss_ref(x: jax.Array, y: jax.Array) -> jax.Array:
    """Pure-JAX reference (naive 8-tap shifted-slice formulation)."""
    N, C, H, W = x.shape
    d = (x - y).astype(jnp.float32).reshape(N * C, H, W)
    p = jnp.pad(d, ((0, 0), (1, 1), (1, 1)))

    def s(i, j):
        return p[:, i:i + H, j:j + W]

    gx = (s(0, 0) - s(0, 2) + 2.0 * (s(1, 0) - s(1, 2)) + s(2, 0) - s(2, 2)) / 8.0
    gy = (s(0, 0) + 2.0 * s(0, 1) + s(0, 2) - s(2, 0) - 2.0 * s(2, 1) - s(2, 2)) / 8.0
    return jnp.mean(gx * gx + gy * gy)


if __name__ == "__main__":
    key = jax.random.PRNGKey(0)
    k1, k2, k3, k4 = jax.random.split(key, 4)

    # Spec shapes: (N, C, H, W) = (2, 4, 16, 16) -> single 128-lane block.
    N, C, H, W = 2, 4, 16, 16
    x = jax.random.normal(k1, (N, C, H, W), dtype=jnp.float32)
    y = jax.random.normal(k2, (N, C, H, W), dtype=jnp.float32)
    ref = jax.block_until_ready(high_freq_loss_ref(x, y))
    out = jax.block_until_ready(high_freq_loss(x, y))
    assert jnp.allclose(out, ref, rtol=1e-4, atol=1e-6), (out, ref)

    # Larger flattened batch: B = 320 -> 2 x 256-lane blocks (last half zero),
    # exercising the multi-block "parallel" grid + zero lane padding.
    N2, C2, H2, W2 = 2, 160, 8, 8
    x2 = jax.random.normal(k3, (N2, C2, H2, W2), dtype=jnp.float32)
    y2 = jax.random.normal(k4, (N2, C2, H2, W2), dtype=jnp.float32)
    ref2 = jax.block_until_ready(high_freq_loss_ref(x2, y2))
    out2 = jax.block_until_ready(high_freq_loss(x2, y2))
    assert jnp.allclose(out2, ref2, rtol=1e-4, atol=1e-6), (out2, ref2)

    # Explicit 128-lane blocks -> 3 grid blocks over the same data.
    out3 = jax.block_until_ready(high_freq_loss(x2, y2, block_lanes=128))
    assert jnp.allclose(out3, ref2, rtol=1e-4, atol=1e-6), (out3, ref2)

    print("KERNEL_OK")
</pallas_src>

<mosaic_0001>
module attributes {stable_mosaic.version = 11 : i64} {
  func.func @_sobel_kernel(%arg0: i32, %arg1: memref<18x18x128xf32, #tpu.memory_space<vmem>>, %arg2: memref<1x16x128xf32, #tpu.memory_space<vmem>>) attributes {dimension_semantics = [#tpu.dimension_semantics<parallel>], iteration_bounds = array<i64: 1>, scalar_prefetch = 0 : i64, scratch_operands = 0 : i64, tpu.core_type = #tpu.core_type<tc>, window_params = [{transform_indices = @transform_0, window_bounds = array<i64: 18, 18, 128>}, {transform_indices = @transform_1, window_bounds = array<i64: 1, 16, 128>}]} {
    %c0 = arith.constant 0 : index
    %c0_0 = arith.constant 0 : index
    %c0_1 = arith.constant 0 : index
    %0 = vector.load %arg1[%c0, %c0_0, %c0_1] : memref<18x18x128xf32, #tpu.memory_space<vmem>>, vector<18x18x128xf32>
    %1 = vector.extract_strided_slice %0 {offsets = [0, 0, 0], sizes = [18, 16, 128], strides = [1, 1, 1]} : vector<18x18x128xf32> to vector<18x16x128xf32>
    %2 = vector.extract_strided_slice %0 {offsets = [0, 1, 0], sizes = [18, 16, 128], strides = [1, 1, 1]} : vector<18x18x128xf32> to vector<18x16x128xf32>
    %3 = vector.extract_strided_slice %0 {offsets = [0, 2, 0], sizes = [18, 16, 128], strides = [1, 1, 1]} : vector<18x18x128xf32> to vector<18x16x128xf32>
    %4 = arith.subf %1, %3 : vector<18x16x128xf32>
    %cst = arith.constant 2.000000e+00 : f32
    %5 = vector.broadcast %cst : f32 to vector<18x16x128xf32>
    %6 = arith.mulf %5, %2 : vector<18x16x128xf32>
    %7 = arith.addf %1, %6 : vector<18x16x128xf32>
    %8 = arith.addf %7, %3 : vector<18x16x128xf32>
    %9 = vector.extract_strided_slice %4 {offsets = [0, 0, 0], sizes = [16, 16, 128], strides = [1, 1, 1]} : vector<18x16x128xf32> to vector<16x16x128xf32>
    %10 = vector.extract_strided_slice %4 {offsets = [1, 0, 0], sizes = [16, 16, 128], strides = [1, 1, 1]} : vector<18x16x128xf32> to vector<16x16x128xf32>
    %cst_2 = arith.constant 2.000000e+00 : f32
    %11 = vector.broadcast %cst_2 : f32 to vector<16x16x128xf32>
    %12 = arith.mulf %11, %10 : vector<16x16x128xf32>
    %13 = arith.addf %9, %12 : vector<16x16x128xf32>
    %14 = vector.extract_strided_slice %4 {offsets = [2, 0, 0], sizes = [16, 16, 128], strides = [1, 1, 1]} : vector<18x16x128xf32> to vector<16x16x128xf32>
    %15 = arith.addf %13, %14 : vector<16x16x128xf32>
    %16 = vector.extract_strided_slice %8 {offsets = [0, 0, 0], sizes = [16, 16, 128], strides = [1, 1, 1]} : vector<18x16x128xf32> to vector<16x16x128xf32>
    %17 = vector.extract_strided_slice %8 {offsets = [2, 0, 0], sizes = [16, 16, 128], strides = [1, 1, 1]} : vector<18x16x128xf32> to vector<16x16x128xf32>
    %18 = arith.subf %16, %17 : vector<16x16x128xf32>
    %19 = arith.mulf %15, %15 : vector<16x16x128xf32>
    %20 = arith.mulf %18, %18 : vector<16x16x128xf32>
    %21 = arith.addf %19, %20 : vector<16x16x128xf32>
    %cst_3 = arith.constant dense<0.000000e+00> : vector<16x128xf32>
    %22 = vector.multi_reduction <add>, %21, %cst_3 [0] : vector<16x16x128xf32> to vector<16x128xf32>
    %23 = vector.shape_cast %22 : vector<16x128xf32> to vector<1x16x128xf32>
    %c0_4 = arith.constant 0 : index
    %c0_5 = arith.constant 0 : index
    %c0_6 = arith.constant 0 : index
    %24 = vector.load %arg2[%c0_4, %c0_5, %c0_6] : memref<1x16x128xf32, #tpu.memory_space<vmem>>, vector<1x16x128xf32>
    tpu.vector_store %arg2[%c0_4, %c0_5, %c0_6], %23 {strides = array<i32>} : memref<1x16x128xf32, #tpu.memory_space<vmem>>, vector<1x16x128xf32>,
    return
  }
  func.func @transform_0(%arg0: i32) -> (i32, i32, i32) {
    %c0_i32 = arith.constant 0 : i32
    %c0_i32_0 = arith.constant 0 : i32
    %c0_i32_1 = arith.constant 0 : i32
    return %c0_i32, %c0_i32_0, %arg0 : i32, i32, i32
  }
  func.func @transform_1(%arg0: i32) -> (i32, i32, i32) {
    %c0_i32 = arith.constant 0 : i32
    %c0_i32_0 = arith.constant 0 : i32
    %c0_i32_1 = arith.constant 0 : i32
    return %arg0, %c0_i32, %c0_i32_0 : i32, i32, i32
  }
}

</mosaic_0001>

<bundles_post_ra>
// kernel: tpu_custom_call.1
= control target key start
LH: loop header
LB: loop body
LE: loop exit
PB: predicated region body
PF: predicated region fallthrough
CT: control target
= control target key end

     0   :  { %6 = vsyncpa [#allocation3], 0  ;;  %s2124_s0 = inlined_call_operand.hbm [shape: f32[18,18,128], index: 0, kind: input, shape index: {}]   ;;  %s2125_s1 = inlined_call_operand.hbm [shape: f32[1,16,128], index: 1, kind: output, shape index: {}]  }
   0x1   :  { %7 = vsyncpa [#allocation4], 0  ;;  %s12_s8 = sshll.u32 %s2124_s0, 4  ;;  %s934_s9 = smov [#allocation2]   ;;  %s13_s8 = int_to_ptr.hbm [resolvable:$true] %s12_s8 }
   0x2   :  { %s14_s10 = sshll.u32 %s934_s9, 4  ;;  %s935_s11 = smov 128   ;;  %s15_s10 = int_to_ptr.vmem [resolvable:$true] %s14_s10 }
   0x3   :  { %s936_s12 = smov 8  }
   0x4   :  { %20 = dma.hbm_to_vmem [thread:$0]  %s13_s8, 6912, %s15_s10, [#allocation3], %s935_s11, %s935_s11, %s936_s12  }
   0x5   :  { %930 = dma.done.wait [#allocation3], 6912  }
   0x6   :  { %931 = vsyncadd [#allocation3], 4294960384  ;;  %v954_v0 = vld [vmem:[#allocation2] sm:$0xff]  ;;  %v956_v1 = vld [vmem:[#allocation2 + $0x8] sm:$0xff]  ;;  %vm133_vm0 = vcmask 1045504   ;;  %vm404_vm1 = vcmask 1046528  }
   0x7   :  { %2303 = vst [vmem:[#allocation8_spill] sm:$0xff] %v954_v0  ;;  %v958_v2 = vld [vmem:[#allocation2 + $0x18] sm:$0xff]  ;;  %v960_v3 = vld [vmem:[#allocation2 + $0x20] sm:$0xff]  ;;  %v962_v4 = vld [vmem:[#allocation2 + $0x10] sm:$0x3]  ;;  %v134_v5 = vrot.slane %v954_v0, 2 }
   0x8   :  { %2304 = vst [vmem:[#allocation9_spill] sm:$0xff] %v956_v1  ;;  %v135_v6 = vrot.slane %v956_v1, 2  ;;  %v966_v7 = vld [vmem:[#allocation2 + $0x28] sm:$0x3]  ;;  %v968_v8 = vld [vmem:[#allocation2 + $0x30] sm:$0xff]  ;;  %v970_v9 = vld [vmem:[#allocation2 + $0x38] sm:$0xff] }
   0x9   :  { %2305 = vst [vmem:[#allocation10_spill] sm:$0xff] %v958_v2  ;;  %v137_v10 = vrot.slane %v962_v4, 2  ;;  %v973_v11 = vld [vmem:[#allocation2 + $0x40] sm:$0x3]  ;;  %v139_v12 = vrot.slane %v958_v2, 2  ;;  %v140_v13 = vrot.slane %v960_v3, 2 }
   0xa   :  { %2306 = vst [vmem:[#allocation11_spill] sm:$0xff] %v960_v3  ;;  %v977_v14 = vld [vmem:[#allocation2 + $0x48] sm:$0xff]  ;;  %v979_v15 = vld [vmem:[#allocation2 + $0x50] sm:$0xff]  ;;  %v981_v16 = vld [vmem:[#allocation2 + $0x58] sm:$0x3]  ;;  %v984_v17 = vsel %vm133_vm0, %v134_v5, %v135_v6  ;;  %v142_v18 = vrot.slane %v966_v7, 2 }
   0xb   :  { %2307 = vst [vmem:[#allocation12_spill] sm:$0xff] %v962_v4  ;;  %v144_v19 = vrot.slane %v968_v8, 2  ;;  %v145_v20 = vrot.slane %v970_v9, 2  ;;  %v989_v21 = vld [vmem:[#allocation2 + $0x60] sm:$0xff]  ;;  %v991_v22 = vld [vmem:[#allocation2 + $0x68] sm:$0xff]  ;;  %v994_v23 = vsel %vm133_vm0, %v135_v6, %v137_v10  ;;  %v147_v24 = vrot.slane %v973_v11, 2 }
   0xc   :  { %2308 = vst [vmem:[#allocation13_spill] sm:$0xff] %v966_v7  ;;  %v149_v25 = vrot.slane %v977_v14, 2  ;;  %v150_v26 = vrot.slane %v979_v15, 2  ;;  %v999_v27 = vld [vmem:[#allocation2 + $0x70] sm:$0x3]  ;;  %v1002_v28 = vsel %vm133_vm0, %v139_v12, %v140_v13  ;;  %v152_v29 = vrot.slane %v981_v16, 2 }
   0xd   :  { %2309 = vst [vmem:[#allocation14_spill] sm:$0xff] %v968_v8  ;;  %v154_v30 = vrot.slane %v989_v21, 2  ;;  %v155_v31 = vrot.slane %v991_v22, 2  ;;  %v157_v32 = vrot.slane %v999_v27, 2  ;;  %v1008_v33 = vld [vmem:[#allocation2 + $0x78] sm:$0xff]  ;;  %v1010_v34 = vld [vmem:[#allocation2 + $0x80] sm:$0xff]  ;;  %v1013_v35 = vsel %vm133_vm0, %v140_v13, %v142_v18 }
   0xe   :  { %2310 = vst [vmem:[#allocation15_spill] sm:$0xff] %v970_v9  ;;  %v1016_v36 = vsel %vm133_vm0, %v144_v19, %v145_v20  ;;  %v1020_v38 = vld [vmem:[#allocation2 + $0x88] sm:$0x3]  ;;  %v1022_v39 = vld [vmem:[#allocation2 + $0x90] sm:$0xff]  ;;  %v1024_v40 = vld [vmem:[#allocation2 + $0xa0] sm:$0x3]  ;;  %v1027_v41 = vsel %vm133_vm0, %v145_v20, %v147_v24  ;;  %v1030_v42 = vsel %vm133_vm0, %v149_v25, %v150_v26  ;;  %v1036_v44 = vsub.f32 %v958_v2, %v1002_v28 }
   0xf   :  { %2311 = vst [vmem:[#allocation16_spill] sm:$0xff] %v973_v11  ;;  %v1038_v45 = vld [vmem:[#allocation2 + $0x98] sm:$0xff]  ;;  %v1040_v46 = vld [vmem:[#allocation2 + $0xa8] sm:$0xff]  ;;  %v1045_v48 = vsel %vm133_vm0, %v150_v26, %v152_v29  ;;  %v1048_v49 = vsel %vm133_vm0, %v154_v30, %v155_v31  ;;  %v159_v50 = vrot.slane %v1008_v33, 2  ;;  %v160_v51 = vrot.slane %v1010_v34, 2  ;;  %v1052_v52 = vld [vmem:[#allocation2 + $0xb0] sm:$0xff] }
  0x10   :  { %2312 = vst [vmem:[#allocation17_spill] sm:$0xff] %v977_v14  ;;  %v1042_v47 = vld [vmem:[#allocation2 + $0xb8] sm:$0x3]  ;;  %v1054_v53 = vld [vmem:[#allocation2 + $0xc0] sm:$0xff]  ;;  %v1056_v54 = vld [vmem:[#allocation2 + $0xd0] sm:$0x3]  ;;  %v1059_v55 = vsel %vm133_vm0, %v155_v31, %v157_v32  ;;  %v1065_v58 = vsub.f32 %v960_v3, %v1013_v35  ;;  %v1078_v6 = vsub.f32 %v968_v8, %v1016_v36 }
  0x11   :  { %2313 = vst [vmem:[#allocation18_spill] sm:$0xff] %v979_v15  ;;  %v162_v56 = vrot.slane %v1020_v38, 2  ;;  %v164_v57 = vrot.slane %v1022_v39, 2  ;;  %v1067_v59 = vld [vmem:[#allocation2 + $0xc8] sm:$0xff]  ;;  %v1069_v60 = vld [vmem:[#allocation2 + $0xd8] sm:$0xff]  ;;  %v1071_v61 = vld [vmem:[#allocation2 + $0xe0] sm:$0xff]  ;;  %v1095_v31 = vsel %vm133_vm0, %v159_v50, %v160_v51  ;;  %v1116_v50 = vsub.f32 %v970_v9, %v1027_v41 }
  0x12   :  { %2314 = vst [vmem:[#allocation19_spill] sm:$0xff] %v981_v16  ;;  %v165_v62 = vrot.slane %v1038_v45, 2  ;;  %v167_v63 = vrot.slane %v1024_v40, 2  ;;  %v169_v5 = vrot.slane %v1040_v46, 2  ;;  %v1080_v10 = vld [vmem:[#allocation2 + $0xe8] sm:$0x3] }
  0x13   :  { %2315 = vst [vmem:[#allocation20_spill] sm:$0xff] %v984_v17  ;;  %v170_v12 = vrot.slane %v1052_v52, 2  ;;  %v172_v13 = vrot.slane %v1042_v47, 2  ;;  %v174_v18 = vrot.slane %v1054_v53, 2  ;;  %v175_v19 = vrot.slane %v1067_v59, 2  ;;  %v1086_v20 = vld [vmem:[#allocation2 + $0xf0] sm:$0xff] }
  0x14   :  { %2316 = vst [vmem:[#allocation21_spill] sm:$0xff] %v989_v21  ;;  %v1088_v24 = vld [vmem:[#allocation2 + $0xf8] sm:$0xff]  ;;  %v177_v25 = vrot.slane %v1056_v54, 2  ;;  %v179_v26 = vrot.slane %v1069_v60, 2  ;;  %v180_v29 = vrot.slane %v1071_v61, 2  ;;  %v182_v30 = vrot.slane %v1080_v10, 2 }
  0x15   :  { %2317 = vst [vmem:[#allocation22_spill] sm:$0xff] %v991_v22  ;;  %v1098_v32 = vsel %vm133_vm0, %v160_v51, %v162_v56  ;;  %v184_v43 = vrot.slane %v1086_v20, 2  ;;  %v185_v37 = vrot.slane %v1088_v24, 2  ;;  %v1120_v51 = vsub.f32 %v977_v14, %v1030_v42  ;;  %v1122_v56 = vld [vmem:[#allocation2 + $0x118] sm:$0x3]  ;;  %v1196_v9 = vld [vmem:[#allocation2 + $0x1a0] sm:$0xff] }
  0x16   :  { %2318 = vst [vmem:[#allocation23_spill] sm:$0xff] %v994_v23  ;;  %v1126_v23 = vld [vmem:[#allocation2 + $0x128] sm:$0xff]  ;;  %v1128_v17 = vld [vmem:[#allocation2 + $0x130] sm:$0x3]  ;;  %v1194_v11 = vld [vmem:[#allocation2 + $0x198] sm:$0xff]  ;;  %s937_s0 = smov [#allocation5]  }
  0x17   :  { %2319 = vst [vmem:[#allocation24_spill] sm:$0xff] %v999_v27  ;;  %v195_v27 = vrot.slane %v1126_v23, 2  ;;  %v1202_v3 = vld [vmem:[#allocation2 + $0x1a8] sm:$0x3]  ;;  %s863_s13 = sshll.u32 %s937_s0, 4  ;;  %s865_s16 = sshll.u32 %s2125_s1, 4  ;;  %s864_s13 = int_to_ptr.vmem [resolvable:$true] %s863_s13  ;;  %s866_s16 = int_to_ptr.hbm [resolvable:$true] %s865_s16 }
  0x18   :  { %2320 = vst [vmem:[#allocation25_spill] sm:$0xff] %v1002_v28  ;;  %v1124_v28 = vld [vmem:[#allocation2 + $0x120] sm:$0xff] }
  0x19   :  { %2321 = vst [vmem:[#allocation26_spill] sm:$0xff] %v1008_v33 }
  0x1a   :  { %2322 = vst [vmem:[#allocation27_spill] sm:$0xff] %v1010_v34 }
  0x1b   :  { %2323 = vst [vmem:[#allocation28_spill] sm:$0xff] %v1013_v35  ;;  %v1112_v35 = vsel %vm133_vm0, %v165_v62, %v167_v63  ;;  %v1137_v63 = vsel %vm133_vm0, %v174_v18, %v175_v19  ;;  %v1162_v18 = vsub.f32 %v989_v21, %v1048_v49  ;;  %v1188_v21 = vld [vmem:[#allocation2 + $0x190] sm:$0x3] }
  0x1c   :  { %2324 = vst [vmem:[#allocation29_spill] sm:$0xff] %v1016_v36  ;;  %v1109_v36 = vsel %vm133_vm0, %v164_v57, %v165_v62  ;;  %v1131_v57 = vsel %vm133_vm0, %v169_v5, %v170_v12  ;;  %v1134_v62 = vsel %vm133_vm0, %v170_v12, %v172_v13  ;;  %v1152_v5 = vsel %vm133_vm0, %v175_v19, %v177_v25 }
  0x1d   :  { %2325 = vst [vmem:[#allocation30_spill] sm:$0xff] %v1020_v38  ;;  %v1155_v12 = vsel %vm133_vm0, %v179_v26, %v180_v29  ;;  %v1158_v13 = vsel %vm133_vm0, %v180_v29, %v182_v30  ;;  %v1173_v19 = vsel %vm133_vm0, %v184_v43, %v185_v37  ;;  %v1178_v30 = vld [vmem:[#allocation2 + $0x178] sm:$0x3]  ;;  %v194_v38 = vrot.slane %v1124_v28, 2 }
  0x1e   :  { %2326 = vst [vmem:[#allocation31_spill] sm:$0xff] %v1022_v39  ;;  %v197_v43 = vrot.slane %v1128_v17, 2  ;;  %v212_v2 = vrot.slane %v1178_v30, 2  ;;  %v217_v1 = vrot.slane %v1188_v21, 2 }
  0x1f   :  { %2327 = vst [vmem:[#allocation32_spill] sm:$0xff] %v1024_v40  ;;  %v192_v40 = vrot.slane %v1122_v56, 2 }
  0x20   :  { %2328 = vst [vmem:[#allocation33_spill] sm:$0xff] %v1027_v41  ;;  %v1147_v41 = vld [vmem:[#allocation2 + $0x148] sm:$0x3] }
  0x21   :  { %2329 = vst [vmem:[#allocation34_spill] sm:$0xff] %v1030_v42  ;;  %v1145_v42 = vld [vmem:[#allocation2 + $0x140] sm:$0xff] }
  0x22   :  { %2330 = vst [vmem:[#allocation35_spill] sm:$0xff] %v1036_v44  ;;  %v1106_v44 = vld [vmem:[#allocation2 + $0x110] sm:$0xff]  ;;  %v200_v16 = vrot.slane %v1145_v42, 2 }
  0x23   :  { %2331 = vst [vmem:[#allocation36_spill] sm:$0xff] %v1038_v45  ;;  %v190_v29 = vrot.slane %v1106_v44, 2 }
  0x24   :  { %2332 = vst [vmem:[#allocation37_spill] sm:$0xff] %v1040_v46 }
  0x25   :  { %2333 = vst [vmem:[#allocation38_spill] sm:$0xff] %v1042_v47  ;;  %v1170_v47 = vld [vmem:[#allocation2 + $0x170] sm:$0xff] }
  0x26   :  { %2334 = vst [vmem:[#allocation39_spill] sm:$0xff] %v1045_v48  ;;  %v210_v7 = vrot.slane %v1170_v47, 2 }
  0x27   :  { %2335 = vst [vmem:[#allocation40_spill] sm:$0xff] %v1048_v49  ;;  %v1182_v49 = vld [vmem:[#allocation2 + $0x188] sm:$0xff] }
  0x28   :  { %2336 = vst [vmem:[#allocation41_spill] sm:$0xff] %v1052_v52  ;;  %v215_v4 = vrot.slane %v1182_v49, 2 }
  0x29   :  { %2337 = vst [vmem:[#allocation42_spill] sm:$0xff] %v1054_v53 }
  0x2a   :  { %2338 = vst [vmem:[#allocation43_spill] sm:$0xff] %v1056_v54  ;;  %v1168_v54 = vld [vmem:[#allocation2 + $0x168] sm:$0xff] }
  0x2b   :  { %2339 = vst [vmem:[#allocation44_spill] sm:$0xff] %v1059_v55 }
  0x2c   :  { %2340 = vst [vmem:[#allocation45_spill] sm:$0xff] %v1065_v58  ;;  %v1104_v58 = vld [vmem:[#allocation2 + $0x108] sm:$0xff] }
  0x2d   :  { %2341 = vst [vmem:[#allocation46_spill] sm:$0xff] %v1067_v59  ;;  %v189_v26 = vrot.slane %v1104_v58, 2 }
  0x2e   :  { %2342 = vst [vmem:[#allocation47_spill] sm:$0xff] %v1069_v60 }
  0x2f   :  { %2343 = vst [vmem:[#allocation48_spill] sm:$0xff] %v1071_v61 }
  0x30   :  { %2344 = vst [vmem:[#allocation49_spill] sm:$0xff] %v1078_v6  ;;  %v1102_v6 = vld [vmem:[#allocation2 + $0x100] sm:$0x3] }
  0x31   :  { %2345 = vst [vmem:[#allocation50_spill] sm:$0xff] %v1080_v10  ;;  %v1149_v10 = vld [vmem:[#allocation2 + $0x150] sm:$0xff]  ;;  %v187_v25 = vrot.slane %v1102_v6, 2 }
  0x32   :  { %2346 = vst [vmem:[#allocation51_spill] sm:$0xff] %v1086_v20  ;;  %v204_v14 = vrot.slane %v1149_v10, 2 }
  0x33   :  { %2347 = vst [vmem:[#allocation52_spill] sm:$0xff] %v1088_v24  ;;  %v1209_v0 = vsel %vm133_vm0, %v185_v37, %v187_v25 }
  0x34   :  { %2348 = vst [vmem:[#allocation53_spill] sm:$0xff] %v1095_v31 }
  0x35   :  { %2349 = vst [vmem:[#allocation54_spill] sm:$0xff] %v1098_v32 }
  0x36   :  { %2350 = vst [vmem:[#allocation55_spill] sm:$0xff] %v1102_v6 }
  0x37   :  { %2351 = vst [vmem:[#allocation56_spill] sm:$0xff] %v1104_v58 }
  0x38   :  { %2352 = vst [vmem:[#allocation57_spill] sm:$0xff] %v1106_v44 }
  0x39   :  { %2353 = vst [vmem:[#allocation58_spill] sm:$0xff] %v1109_v36 }
  0x3a   :  { %2354 = vst [vmem:[#allocation59_spill] sm:$0xff] %v1112_v35 }
  0x3b   :  { %2355 = vst [vmem:[#allocation60_spill] sm:$0xff] %v1116_v50  ;;  %v1143_v50 = vld [vmem:[#allocation2 + $0x138] sm:$0xff] }
  0x3c   :  { %2356 = vst [vmem:[#allocation61_spill] sm:$0xff] %v1120_v51  ;;  %v1141_v51 = vsub.f32 %v979_v15, %v1045_v48  ;;  %v1166_v48 = vld [vmem:[#allocation2 + $0x160] sm:$0x3]  ;;  %v199_v6 = vrot.slane %v1143_v50, 2  ;;  %v202_v15 = vrot.slane %v1147_v41, 2 }
  0x3d   :  { %2357 = vst [vmem:[#allocation62_spill] sm:$0xff] %v1122_v56  ;;  %v207_v8 = vrot.slane %v1166_v48, 2 }
  0x3e   :  { %2358 = vst [vmem:[#allocation63_spill] sm:$0xff] %v1124_v28  ;;  %v1227_v37 = vsel %vm133_vm0, %v199_v6, %v200_v16  ;;  %v1230_v25 = vsel %vm133_vm0, %v200_v16, %v202_v15  ;;  %v1248_v6 = vsel %vm133_vm0, %v215_v4, %v217_v1  ;;  %v1270_v1 = vsub.f32 %v1022_v39, %v1109_v36 }
  0x3f   :  { %2359 = vst [vmem:[#allocation64_spill] sm:$0xff] %v1126_v23  ;;  %v1278_v16 = vsub.f32 %v1040_v46, %v1131_v57  ;;  %v1427_v36 = vmul.f32 2.0, %v1052_v52 }
  0x40   :  { %2360 = vst [vmem:[#allocation65_spill] sm:$0xff] %v1128_v17  ;;  %v209_v17 = vrot.slane %v1168_v54, 2 }
  0x41   :  { %2361 = vst [vmem:[#allocation66_spill] sm:$0xff] %v1131_v57  ;;  %v2444_v57 = vld [vmem:[#allocation32_spill] sm:$0xff] }
  0x42   :  { %2362 = vst [vmem:[#allocation67_spill] sm:$0xff] %v1134_v62 }
  0x43   :  { %2363 = vst [vmem:[#allocation68_spill] sm:$0xff] %v1137_v63 }
  0x44   :  { %2364 = vst [vmem:[#allocation69_spill] sm:$0xff] %v1141_v51  ;;  %v1164_v51 = vld [vmem:[#allocation2 + $0x158] sm:$0xff] }
  0x45   :  { %2365 = vst [vmem:[#allocation70_spill] sm:$0xff] %v1143_v50  ;;  %v205_v56 = vrot.slane %v1164_v51, 2 }
  0x46   :  { %2366 = vst [vmem:[#allocation71_spill] sm:$0xff] %v1145_v42 }
  0x47   :  { %2367 = vst [vmem:[#allocation72_spill] sm:$0xff] %v1147_v41 }
  0x48   :  { %2368 = vst [vmem:[#allocation73_spill] sm:$0xff] %v1149_v10 }
  0x49   :  { %2369 = vst [vmem:[#allocation74_spill] sm:$0xff] %v1152_v5 }
  0x4a   :  { %2370 = vst [vmem:[#allocation75_spill] sm:$0xff] %v1155_v12 }
  0x4b   :  { %2371 = vst [vmem:[#allocation76_spill] sm:$0xff] %v1158_v13 }
  0x4c   :  { %2372 = vst [vmem:[#allocation77_spill] sm:$0xff] %v1162_v18  ;;  %v1180_v18 = vld [vmem:[#allocation2 + $0x180] sm:$0xff] }
  0x4d   :  { %2373 = vst [vmem:[#allocation78_spill] sm:$0xff] %v1164_v51  ;;  %v214_v41 = vrot.slane %v1180_v18, 2  ;;  %v219_v51 = vrot.slane %v1194_v11, 2 }
  0x4e   :  { %2374 = vst [vmem:[#allocation79_spill] sm:$0xff] %v1166_v48  ;;  %v220_v48 = vrot.slane %v1196_v9, 2 }
  0x4f   :  { %2375 = vst [vmem:[#allocation80_spill] sm:$0xff] %v1168_v54  ;;  %v222_v54 = vrot.slane %v1202_v3, 2 }
  0x50   :  { %2376 = vst [vmem:[#allocation81_spill] sm:$0xff] %v1170_v47  ;;  %v1215_v47 = vsel %vm133_vm0, %v189_v26, %v190_v29  ;;  %v1236_v26 = vsel %vm133_vm0, %v205_v56, %v207_v8  ;;  %v1251_v15 = vsel %vm133_vm0, %v219_v51, %v220_v48  ;;  %v1258_v8 = vsub.f32 %v991_v22, %v1059_v55 }
  0x51   :  { %2377 = vst [vmem:[#allocation82_spill] sm:$0xff] %v1173_v19  ;;  %v1298_v51 = vsub.f32 %v1071_v61, %v1158_v13  ;;  %v1436_v55 = vmul.f32 2.0, %v1067_v59 }
  0x52   :  { %2378 = vst [vmem:[#allocation83_spill] sm:$0xff] %v1178_v30  ;;  %v1218_v30 = vsel %vm133_vm0, %v190_v29, %v192_v40  ;;  %v1239_v40 = vsel %vm133_vm0, %v209_v17, %v210_v7  ;;  %v1282_v17 = vsub.f32 %v1052_v52, %v1134_v62  ;;  %v1306_v29 = vsub.f32 %v1088_v24, %v1209_v0  ;;  %v2447_v52 = vld [vmem:[#allocation50_spill] sm:$0xff] }
  0x53   :  { %2379 = vst [vmem:[#allocation84_spill] sm:$0xff] %v1180_v18  ;;  %v1221_v18 = vsel %vm133_vm0, %v194_v38, %v195_v27  ;;  %v1242_v38 = vsel %vm133_vm0, %v210_v7, %v212_v2  ;;  %v1262_v2 = vsub.f32 %v1008_v33, %v1095_v31  ;;  %v1266_v7 = vsub.f32 %v1010_v34, %v1098_v32  ;;  %v2445_v32 = vld [vmem:[#allocation38_spill] sm:$0xff] }
  0x54   :  { %2380 = vst [vmem:[#allocation85_spill] sm:$0xff] %v1182_v49  ;;  %v1418_v62 = vmul.f32 2.0, %v1038_v45  ;;  %v1430_v31 = vmul.f32 2.0, %v2445_v32  ;;  %v1451_v32 = vmul.f32 2.0, %v1086_v20 }
  0x55   :  { %2381 = vst [vmem:[#allocation86_spill] sm:$0xff] %v1188_v21  ;;  %v1224_v21 = vsel %vm133_vm0, %v195_v27, %v197_v43  ;;  %v1245_v27 = vsel %vm133_vm0, %v214_v41, %v215_v4  ;;  %v1274_v4 = vsub.f32 %v1038_v45, %v1112_v35  ;;  %v1286_v41 = vsub.f32 %v1054_v53, %v1137_v63  ;;  %v2446_v45 = vld [vmem:[#allocation43_spill] sm:$0xff] }
  0x56   :  { %2382 = vst [vmem:[#allocation87_spill] sm:$0xff] %v1194_v11  ;;  %v1310_v43 = vsub.f32 %v1104_v58, %v1215_v47  ;;  %v1421_v35 = vmul.f32 2.0, %v2444_v57  ;;  %v1442_v57 = vmul.f32 2.0, %v1069_v60 }
  0x57   :  { %2383 = vst [vmem:[#allocation88_spill] sm:$0xff] %v1196_v9 }
  0x58   :  { %2384 = vst [vmem:[#allocation89_spill] sm:$0xff] %v1202_v3  ;;  %v1233_v3 = vsel %vm133_vm0, %v204_v14, %v205_v56  ;;  %v1254_v14 = vsel %vm133_vm0, %v220_v48, %v222_v54  ;;  %v1290_v48 = vsub.f32 %v1067_v59, %v1152_v5  ;;  %v1294_v54 = vsub.f32 %v1069_v60, %v1155_v12  ;;  %v2443_v5 = vld [vmem:[#allocation30_spill] sm:$0xff]  ;;  %v2448_v59 = vld [vmem:[#allocation55_spill] sm:$0xff] }
  0x59   :  { %2385 = vst [vmem:[#allocation90_spill] sm:$0xff] %v1209_v0  ;;  %v1302_v56 = vsub.f32 %v1086_v20, %v1173_v19  ;;  %v1400_v0 = vmul.f32 2.0, %v991_v22  ;;  %v2442_v19 = vld [vmem:[#allocation24_spill] sm:$0xff]  ;;  %v1409_v12 = vmul.f32 2.0, %v1010_v34  ;;  %v1412_v63 = vmul.f32 2.0, %v2443_v5 }
  0x5a   :  { %2386 = vst [vmem:[#allocation91_spill] sm:$0xff] %v1215_v47  ;;  %v1403_v13 = vmul.f32 2.0, %v2442_v19  ;;  %v1424_v19 = vmul.f32 2.0, %v1040_v46  ;;  %v1433_v5 = vmul.f32 2.0, %v1054_v53  ;;  %v1445_v46 = vmul.f32 2.0, %v1071_v61  ;;  %v2449_v61 = vld [vmem:[#allocation62_spill] sm:$0xff] }
  0x5b   :  { %2387 = vst [vmem:[#allocation92_spill] sm:$0xff] %v1218_v30  ;;  %v1448_v34 = vmul.f32 2.0, %v2447_v52  ;;  %v1454_v53 = vmul.f32 2.0, %v1088_v24  ;;  %v1463_v60 = vmul.f32 2.0, %v1106_v44  ;;  %v1466_v22 = vmul.f32 2.0, %v2449_v61  ;;  %v2450_v24 = vld [vmem:[#allocation65_spill] sm:$0xff] }
  0x5c   :  { %2388 = vst [vmem:[#allocation93_spill] sm:$0xff] %v1221_v18  ;;  %v1469_v52 = vmul.f32 2.0, %v1124_v28  ;;  %v1472_v20 = vmul.f32 2.0, %v1126_v23  ;;  %v1487_v61 = vmul.f32 2.0, %v1149_v10 }
  0x5d   :  { %2389 = vst [vmem:[#allocation94_spill] sm:$0xff] %v1224_v21 }
  0x5e   :  { %2390 = vst [vmem:[#allocation95_spill] sm:$0xff] %v1227_v37 }
  0x5f   :  { %2391 = vst [vmem:[#allocation96_spill] sm:$0xff] %v1230_v25 }
  0x60   :  { %2392 = vst [vmem:[#allocation97_spill] sm:$0xff] %v1233_v3 }
  0x61   :  { %2393 = vst [vmem:[#allocation98_spill] sm:$0xff] %v1236_v26 }
  0x62   :  { %2394 = vst [vmem:[#allocation99_spill] sm:$0xff] %v1239_v40 }
  0x63   :  { %2395 = vst [vmem:[#allocation100_spill] sm:$0xff] %v1242_v38 }
  0x64   :  { %2396 = vst [vmem:[#allocation101_spill] sm:$0xff] %v1245_v27 }
  0x65   :  { %2397 = vst [vmem:[#allocation102_spill] sm:$0xff] %v1248_v6 }
  0x66   :  { %2398 = vst [vmem:[#allocation103_spill] sm:$0xff] %v1251_v15  ;;  %v2435_v15 = vld [vmem:[#allocation14_spill] sm:$0xff] }
  0x67   :  { %2399 = vst [vmem:[#allocation104_spill] sm:$0xff] %v1254_v14  ;;  %v2436_v14 = vld [vmem:[#allocation15_spill] sm:$0xff] }
  0x68   :  { %2400 = vst [vmem:[#allocation105_spill] sm:$0xff] %v1258_v8 }
  0x69   :  { %2401 = vst [vmem:[#allocation106_spill] sm:$0xff] %v1262_v2 }
  0x6a   :  { %2402 = vst [vmem:[#allocation107_spill] sm:$0xff] %v1266_v7  ;;  %v2430_v7 = vld [vmem:[#allocation9_spill] sm:$0xff] }
  0x6b   :  { %2403 = vst [vmem:[#allocation108_spill] sm:$0xff] %v1270_v1  ;;  %v2429_v1 = vld [vmem:[#allocation8_spill] sm:$0xff]  ;;  %v1364_v2 = vmul.f32 2.0, %v2430_v7 }
  0x6c   :  { %2404 = vst [vmem:[#allocation109_spill] sm:$0xff] %v1274_v4 }
  0x6d   :  { %2405 = vst [vmem:[#allocation110_spill] sm:$0xff] %v1278_v16 }
  0x6e   :  { %2406 = vst [vmem:[#allocation111_spill] sm:$0xff] %v1282_v17 }
  0x6f   :  { %2407 = vst [vmem:[#allocation112_spill] sm:$0xff] %v1286_v41 }
  0x70   :  { %2408 = vst [vmem:[#allocation113_spill] sm:$0xff] %v1290_v48  ;;  %v1314_v48 = vsub.f32 %v1106_v44, %v1218_v30  ;;  %v2451_v44 = vld [vmem:[#allocation72_spill] sm:$0xff] }
  0x71   :  { %2409 = vst [vmem:[#allocation114_spill] sm:$0xff] %v1294_v54  ;;  %v1318_v54 = vsub.f32 %v1124_v28, %v1221_v18  ;;  %v2440_v18 = vld [vmem:[#allocation19_spill] sm:$0xff] }
  0x72   :  { %2410 = vst [vmem:[#allocation115_spill] sm:$0xff] %v1298_v51  ;;  %v1322_v51 = vsub.f32 %v1126_v23, %v1224_v21  ;;  %v1394_v30 = vmul.f32 2.0, %v2440_v18  ;;  %v1415_v18 = vmul.f32 2.0, %v1022_v39  ;;  %v1439_v39 = vmul.f32 2.0, %v2446_v45  ;;  %v2452_v23 = vld [vmem:[#allocation79_spill] sm:$0xff] }
  0x73   :  { %2411 = vst [vmem:[#allocation116_spill] sm:$0xff] %v1302_v56  ;;  %v1326_v56 = vsub.f32 %v1143_v50, %v1227_v37  ;;  %v2439_v37 = vld [vmem:[#allocation18_spill] sm:$0xff]  ;;  %v1460_v45 = vmul.f32 2.0, %v1104_v58  ;;  %v1481_v58 = vmul.f32 2.0, %v1145_v42 }
  0x74   :  { %2412 = vst [vmem:[#allocation117_spill] sm:$0xff] %v1306_v29  ;;  %v1330_v29 = vsub.f32 %v1145_v42, %v1230_v25  ;;  %v1391_v21 = vmul.f32 2.0, %v2439_v37  ;;  %v1484_v37 = vmul.f32 2.0, %v2451_v44 }
  0x75   :  { %2413 = vst [vmem:[#allocation118_spill] sm:$0xff] %v1310_v43  ;;  %v1334_v43 = vsub.f32 %v1149_v10, %v1233_v3 }
  0x76   :  { %2414 = vst [vmem:[#allocation119_spill] sm:$0xff] %v1314_v48  ;;  %v2420_v48 = vld [vmem:[#allocation78_spill] sm:$0xff] }
  0x77   :  { %2415 = vst [vmem:[#allocation120_spill] sm:$0xff] %v1318_v54  ;;  %v1338_v41 = vsub.f32 %v2420_v48, %v1236_v26  ;;  %v2422_v54 = vld [vmem:[#allocation80_spill] sm:$0xff]  ;;  %v1490_v28 = vmul.f32 2.0, %v2420_v48 }
  0x78   :  { %2416 = vst [vmem:[#allocation121_spill] sm:$0xff] %v1322_v51  ;;  %v1342_v17 = vsub.f32 %v2422_v54, %v1239_v40  ;;  %v2424_v51 = vld [vmem:[#allocation81_spill] sm:$0xff]  ;;  %v1382_v40 = vmul.f32 2.0, %v2436_v14  ;;  %v2437_v26 = vld [vmem:[#allocation16_spill] sm:$0xff] }
  0x79   :  { %2417 = vst [vmem:[#allocation122_spill] sm:$0xff] %v1326_v56  ;;  %v1346_v16 = vsub.f32 %v2424_v51, %v1242_v38  ;;  %v2426_v56 = vld [vmem:[#allocation84_spill] sm:$0xff]  ;;  %v2434_v38 = vld [vmem:[#allocation13_spill] sm:$0xff]  ;;  %v1385_v3 = vmul.f32 2.0, %v2437_v26  ;;  %v1406_v26 = vmul.f32 2.0, %v1008_v33  ;;  %v1457_v33 = vmul.f32 2.0, %v2448_v59 }
  0x7a   :  { %2418 = vst [vmem:[#allocation123_spill] sm:$0xff] %v1330_v29  ;;  %v1350_v4 = vsub.f32 %v2426_v56, %v1245_v27  ;;  %v1354_v29 = vsub.f32 %v1182_v49, %v1248_v6  ;;  %v2433_v6 = vld [vmem:[#allocation11_spill] sm:$0xff]  ;;  %v1478_v59 = vmul.f32 2.0, %v1143_v50  ;;  %v406_v50 = vrot.slane %v1364_v2, 1 }
  0x7b   :  { %2419 = vst [vmem:[#allocation124_spill] sm:$0xff] %v1334_v43  ;;  %v1376_v43 = vmul.f32 2.0, %v2434_v38  ;;  %v2441_v38 = vld [vmem:[#allocation21_spill] sm:$0xff]  ;;  %v416_v48 = vrot.slane %v1382_v40, 1  ;;  %v2453_v2 = vld [vmem:[#allocation83_spill] sm:$0xff]  ;;  %v1526_v40 = vmul.f32 2.0, %v1196_v9 }
  0x7c   :  { %2421 = vst [vmem:[#allocation125_spill] sm:$0xff] %v1338_v41  ;;  %v1379_v41 = vmul.f32 2.0, %v2435_v15  ;;  %v1397_v47 = vmul.f32 2.0, %v2441_v38  ;;  %v1475_v38 = vmul.f32 2.0, %v2450_v24 }
  0x7d   :  { %2423 = vst [vmem:[#allocation126_spill] sm:$0xff] %v1342_v17  ;;  %v1361_v17 = vmul.f32 2.0, %v2429_v1  ;;  %v413_v10 = vrot.slane %v1376_v43, 1 }
  0x7e   :  { %2425 = vst [vmem:[#allocation127_spill] sm:$0xff] %v1346_v16  ;;  %v2431_v16 = vld [vmem:[#allocation12_spill] sm:$0xff]  ;;  %v415_v15 = vrot.slane %v1379_v41, 1  ;;  %v2454_v41 = vld [vmem:[#allocation86_spill] sm:$0xff] }
  0x7f   :  { %2427 = vst [vmem:[#allocation128_spill] sm:$0xff] %v1350_v4  ;;  %v1367_v8 = vmul.f32 2.0, %v2431_v16  ;;  %v2432_v4 = vld [vmem:[#allocation10_spill] sm:$0xff]  ;;  %v2438_v16 = vld [vmem:[#allocation17_spill] sm:$0xff]  ;;  %v405_v24 = vrot.slane %v1361_v17, 1  ;;  %v1508_v17 = vmul.f32 2.0, %v2424_v51 }
  0x80   :  { %2428 = vst [vmem:[#allocation129_spill] sm:$0xff] %v1354_v29  ;;  %v1370_v27 = vmul.f32 2.0, %v2432_v4  ;;  %v1373_v29 = vmul.f32 2.0, %v2433_v6  ;;  %v1388_v25 = vmul.f32 2.0, %v2438_v16  ;;  %v1493_v16 = vmul.f32 2.0, %v2452_v23  ;;  %v2455_v51 = vld [vmem:[#allocation89_spill] sm:$0xff] }
  0x81   :  { %v408_v42 = vrot.slane %v1367_v8, 1  ;;  %v418_v23 = vrot.slane %v1385_v3, 1  ;;  %v1505_v6 = vmul.f32 2.0, %v2422_v54  ;;  %v1511_v8 = vmul.f32 2.0, %v2453_v2 }
  0x82   :  { %v410_v14 = vrot.slane %v1370_v27, 1  ;;  %v411_v44 = vrot.slane %v1373_v29, 1  ;;  %v1514_v27 = vmul.f32 2.0, %v2426_v56  ;;  %v1517_v29 = vmul.f32 2.0, %v1182_v49 }
  0x83   :  { %v1520_v43 = vmul.f32 2.0, %v2454_v41  ;;  %v1523_v3 = vmul.f32 2.0, %v1194_v11  ;;  %v1529_v54 = vmul.f32 2.0, %v2455_v51  ;;  %v1532_v2 = vsel %vm404_vm1, %v405_v24, %v406_v50 }
  0x84   :  { %v1535_v56 = vsel %vm404_vm1, %v406_v50, %v408_v42  ;;  %v1538_v49 = vsel %vm404_vm1, %v410_v14, %v411_v44  ;;  %v1541_v41 = vsel %vm404_vm1, %v411_v44, %v413_v10  ;;  %v1544_v11 = vsel %vm404_vm1, %v415_v15, %v416_v48 }
  0x85   :  { %v1547_v9 = vsel %vm404_vm1, %v416_v48, %v418_v23  ;;  %v420_v51 = vrot.slane %v1388_v25, 1  ;;  %v421_v24 = vrot.slane %v1391_v21, 1  ;;  %v423_v4 = vrot.slane %v1394_v30, 1 }
  0x86   :  { %v425_v42 = vrot.slane %v1397_v47, 1  ;;  %v426_v50 = vrot.slane %v1400_v0, 1  ;;  %v428_v14 = vrot.slane %v1403_v13, 1  ;;  %v430_v10 = vrot.slane %v1406_v26, 1 }
  0x87   :  { %v431_v15 = vrot.slane %v1409_v12, 1  ;;  %v433_v44 = vrot.slane %v1412_v63, 1  ;;  %v435_v48 = vrot.slane %v1415_v18, 1  ;;  %v436_v25 = vrot.slane %v1418_v62, 1 }
  0x88   :  { %v438_v21 = vrot.slane %v1421_v35, 1  ;;  %v440_v30 = vrot.slane %v1424_v19, 1  ;;  %v441_v47 = vrot.slane %v1427_v36, 1  ;;  %v443_v0 = vrot.slane %v1430_v31, 1 }
  0x89   :  { %v445_v13 = vrot.slane %v1433_v5, 1  ;;  %v446_v26 = vrot.slane %v1436_v55, 1  ;;  %v448_v12 = vrot.slane %v1439_v39, 1  ;;  %v450_v63 = vrot.slane %v1442_v57, 1 }
  0x8a   :  { %v451_v18 = vrot.slane %v1445_v46, 1  ;;  %v453_v62 = vrot.slane %v1448_v34, 1  ;;  %v422_v35 = vsel %vm404_vm1, %v420_v51, %v421_v24  ;;  %v424_v19 = vsel %vm404_vm1, %v421_v24, %v423_v4 }
  0x8b   :  { %v455_v36 = vrot.slane %v1451_v32, 1  ;;  %v456_v31 = vrot.slane %v1454_v53, 1  ;;  %v427_v5 = vsel %vm404_vm1, %v425_v42, %v426_v50  ;;  %v429_v55 = vsel %vm404_vm1, %v426_v50, %v428_v14 }
  0x8c   :  { %v432_v39 = vsel %vm404_vm1, %v430_v10, %v431_v15  ;;  %v434_v57 = vsel %vm404_vm1, %v431_v15, %v433_v44  ;;  %v437_v46 = vsel %vm404_vm1, %v435_v48, %v436_v25  ;;  %v439_v34 = vsel %vm404_vm1, %v436_v25, %v438_v21 }
  0x8d   :  { %v442_v23 = vsel %vm404_vm1, %v440_v30, %v441_v47  ;;  %v444_v4 = vsel %vm404_vm1, %v441_v47, %v443_v0  ;;  %v447_v32 = vsel %vm404_vm1, %v445_v13, %v446_v26  ;;  %v449_v53 = vsel %vm404_vm1, %v446_v26, %v448_v12 }
  0x8e   :  { %v452_v51 = vsel %vm404_vm1, %v450_v63, %v451_v18  ;;  %v454_v24 = vsel %vm404_vm1, %v451_v18, %v453_v62  ;;  %v457_v42 = vsel %vm404_vm1, %v455_v36, %v456_v31  ;;  %v458_v50 = vrot.slane %v1457_v33, 1  ;;  %v2456_v36 = vld [vmem:[#allocation10_spill] sm:$0xff] }
  0x8f   :  { %v460_v14 = vrot.slane %v1460_v45, 1  ;;  %v461_v10 = vrot.slane %v1463_v60, 1  ;;  %v463_v15 = vrot.slane %v1466_v22, 1  ;;  %v465_v44 = vrot.slane %v1469_v52, 1 }
  0x90   :  { %v466_v48 = vrot.slane %v1472_v20, 1  ;;  %v468_v25 = vrot.slane %v1475_v38, 1  ;;  %v470_v21 = vrot.slane %v1478_v59, 1  ;;  %v471_v30 = vrot.slane %v1481_v58, 1 }
  0x91   :  { %v473_v47 = vrot.slane %v1484_v37, 1  ;;  %v475_v33 = vrot.slane %v1487_v61, 1  ;;  %v476_v45 = vrot.slane %v1490_v28, 1  ;;  %v478_v60 = vrot.slane %v1493_v16, 1 }
  0x92   :  { %v480_v22 = vrot.slane %v1505_v6, 1  ;;  %v481_v52 = vrot.slane %v1508_v17, 1  ;;  %v483_v20 = vrot.slane %v1511_v8, 1  ;;  %v485_v38 = vrot.slane %v1514_v27, 1 }
  0x93   :  { %v486_v59 = vrot.slane %v1517_v29, 1  ;;  %v488_v58 = vrot.slane %v1520_v43, 1  ;;  %v459_v37 = vsel %vm404_vm1, %v456_v31, %v458_v50  ;;  %v490_v61 = vrot.slane %v1523_v3, 1  ;;  %v2457_v50 = vld [vmem:[#allocation11_spill] sm:$0xff] }
  0x94   :  { %v491_v28 = vrot.slane %v1526_v40, 1  ;;  %v493_v16 = vrot.slane %v1529_v54, 1  ;;  %v462_v6 = vsel %vm404_vm1, %v460_v14, %v461_v10  ;;  %v464_v17 = vsel %vm404_vm1, %v461_v10, %v463_v15  ;;  %v2458_v10 = vld [vmem:[#allocation14_spill] sm:$0xff] }
  0x95   :  { %v467_v8 = vsel %vm404_vm1, %v465_v44, %v466_v48  ;;  %v469_v27 = vsel %vm404_vm1, %v466_v48, %v468_v25  ;;  %v472_v29 = vsel %vm404_vm1, %v470_v21, %v471_v30  ;;  %v474_v43 = vsel %vm404_vm1, %v471_v30, %v473_v47  ;;  %v2459_v44 = vld [vmem:[#allocation15_spill] sm:$0xff]  ;;  %v2460_v25 = vld [vmem:[#allocation17_spill] sm:$0xff]  ;;  %v2461_v30 = vld [vmem:[#allocation18_spill] sm:$0xff] }
  0x96   :  { %v477_v0 = vsel %vm404_vm1, %v475_v33, %v476_v45  ;;  %v479_v3 = vsel %vm404_vm1, %v476_v45, %v478_v60  ;;  %v482_v40 = vsel %vm404_vm1, %v480_v22, %v481_v52  ;;  %v484_v54 = vsel %vm404_vm1, %v481_v52, %v483_v20  ;;  %v2463_v45 = vld [vmem:[#allocation22_spill] sm:$0xff]  ;;  %v2466_v20 = vld [vmem:[#allocation31_spill] sm:$0xff] }
  0x97   :  { %v487_v13 = vsel %vm404_vm1, %v485_v38, %v486_v59  ;;  %v489_v26 = vsel %vm404_vm1, %v486_v59, %v488_v58  ;;  %v492_v12 = vsel %vm404_vm1, %v490_v61, %v491_v28  ;;  %v494_v63 = vsel %vm404_vm1, %v491_v28, %v493_v16  ;;  %v2464_v60 = vld [vmem:[#allocation26_spill] sm:$0xff]  ;;  %v2467_v38 = vld [vmem:[#allocation36_spill] sm:$0xff]  ;;  %v2469_v61 = vld [vmem:[#allocation41_spill] sm:$0xff] }
  0x98   :  { %v531_v18 = vadd.f32 %v1532_v2, %v2429_v1  ;;  %v532_v62 = vadd.f32 %v1535_v56, %v2430_v7  ;;  %v533_v31 = vadd.f32 %v1538_v49, %v2456_v36  ;;  %v534_v14 = vadd.f32 %v1541_v41, %v2457_v50  ;;  %v2462_v2 = vld [vmem:[#allocation21_spill] sm:$0xff]  ;;  %v2465_v49 = vld [vmem:[#allocation27_spill] sm:$0xff]  ;;  %v2470_v28 = vld [vmem:[#allocation42_spill] sm:$0xff] }
  0x99   :  { %v535_v15 = vadd.f32 %v1544_v11, %v2458_v10  ;;  %v536_v48 = vadd.f32 %v1547_v9, %v2459_v44  ;;  %v537_v21 = vadd.f32 %v422_v35, %v2460_v25  ;;  %v538_v47 = vadd.f32 %v424_v19, %v2461_v30  ;;  %v2468_v11 = vld [vmem:[#allocation37_spill] sm:$0xff]  ;;  %v2471_v16 = vld [vmem:[#allocation46_spill] sm:$0xff]  ;;  %v2472_v36 = vld [vmem:[#allocation47_spill] sm:$0xff] }
  0x9a   :  { %v539_v33 = vadd.f32 %v427_v5, %v2462_v2  ;;  %v540_v56 = vadd.f32 %v429_v55, %v2463_v45  ;;  %v541_v22 = vadd.f32 %v432_v39, %v2464_v60  ;;  %v542_v52 = vadd.f32 %v434_v57, %v2465_v49  ;;  %v2473_v50 = vld [vmem:[#allocation48_spill] sm:$0xff]  ;;  %v2474_v10 = vld [vmem:[#allocation51_spill] sm:$0xff]  ;;  %v2477_v30 = vld [vmem:[#allocation57_spill] sm:$0xff] }
  0x9b   :  { %v543_v41 = vadd.f32 %v437_v46, %v2466_v20  ;;  %v544_v59 = vadd.f32 %v439_v34, %v2467_v38  ;;  %v545_v58 = vadd.f32 %v442_v23, %v2468_v11  ;;  %v546_v9 = vadd.f32 %v444_v4, %v2469_v61  ;;  %v2475_v44 = vld [vmem:[#allocation52_spill] sm:$0xff]  ;;  %v2478_v2 = vld [vmem:[#allocation63_spill] sm:$0xff]  ;;  %v2480_v60 = vld [vmem:[#allocation70_spill] sm:$0xff] }
  0x9c   :  { %v547_v35 = vadd.f32 %v447_v32, %v2470_v28  ;;  %v548_v19 = vadd.f32 %v449_v53, %v2471_v16  ;;  %v549_v5 = vadd.f32 %v452_v51, %v2472_v36  ;;  %v550_v55 = vadd.f32 %v454_v24, %v2473_v50  ;;  %v2476_v25 = vld [vmem:[#allocation56_spill] sm:$0xff]  ;;  %v2481_v49 = vld [vmem:[#allocation71_spill] sm:$0xff]  ;;  %v2482_v20 = vld [vmem:[#allocation73_spill] sm:$0xff] }
  0x9d   :  { %v551_v39 = vadd.f32 %v457_v42, %v2474_v10  ;;  %v552_v57 = vadd.f32 %v459_v37, %v2475_v44  ;;  %v553_v46 = vadd.f32 %v462_v6, %v2476_v25  ;;  %v554_v34 = vadd.f32 %v464_v17, %v2477_v30  ;;  %v2479_v45 = vld [vmem:[#allocation64_spill] sm:$0xff]  ;;  %v2483_v38 = vld [vmem:[#allocation78_spill] sm:$0xff]  ;;  %v2485_v61 = vld [vmem:[#allocation81_spill] sm:$0xff] }
  0x9e   :  { %v555_v23 = vadd.f32 %v467_v8, %v2478_v2  ;;  %v556_v4 = vadd.f32 %v469_v27, %v2479_v45  ;;  %v557_v32 = vadd.f32 %v472_v29, %v2480_v60  ;;  %v558_v53 = vadd.f32 %v474_v43, %v2481_v49  ;;  %v2484_v11 = vld [vmem:[#allocation80_spill] sm:$0xff]  ;;  %v2487_v16 = vld [vmem:[#allocation85_spill] sm:$0xff]  ;;  %v2488_v36 = vld [vmem:[#allocation87_spill] sm:$0xff] }
  0x9f   :  { %v559_v51 = vadd.f32 %v477_v0, %v2482_v20  ;;  %v560_v24 = vadd.f32 %v479_v3, %v2483_v38  ;;  %v561_v42 = vadd.f32 %v482_v40, %v2484_v11  ;;  %v562_v37 = vadd.f32 %v484_v54, %v2485_v61  ;;  %v2486_v28 = vld [vmem:[#allocation84_spill] sm:$0xff]  ;;  %v2492_v43 = vld [vmem:[#allocation23_spill] sm:$0xff]  ;;  %v2494_v0 = vld [vmem:[#allocation25_spill] sm:$0xff] }
  0xa0   :  { %v563_v6 = vadd.f32 %v487_v13, %v2486_v28  ;;  %v564_v17 = vadd.f32 %v489_v26, %v2487_v16  ;;  %v565_v8 = vadd.f32 %v492_v12, %v2488_v36  ;;  %v2489_v50 = vld [vmem:[#allocation88_spill] sm:$0xff]  ;;  %v1670_v44 = vadd.f32 %v532_v62, %v2492_v43  ;;  %v2498_v54 = vld [vmem:[#allocation29_spill] sm:$0xff]  ;;  %v2502_v12 = vld [vmem:[#allocation34_spill] sm:$0xff] }
  0xa1   :  { %v566_v27 = vadd.f32 %v494_v63, %v2489_v50  ;;  %v2490_v10 = vld [vmem:[#allocation20_spill] sm:$0xff]  ;;  %v1673_v3 = vadd.f32 %v533_v31, %v2494_v0  ;;  %v1679_v13 = vadd.f32 %v535_v15, %v2498_v54  ;;  %v2500_v26 = vld [vmem:[#allocation33_spill] sm:$0xff]  ;;  %v1685_v63 = vadd.f32 %v537_v21, %v2502_v12  ;;  %v2512_v15 = vld [vmem:[#allocation54_spill] sm:$0xff] }
  0xa2   :  { %v1667_v29 = vadd.f32 %v531_v18, %v2490_v10  ;;  %2493 = vst [vmem:[#allocation9_spill] sm:$0xff] %v1670_v44  ;;  %v2496_v40 = vld [vmem:[#allocation28_spill] sm:$0xff]  ;;  %v1682_v30 = vadd.f32 %v536_v48, %v2500_v26  ;;  %v2504_v18 = vld [vmem:[#allocation39_spill] sm:$0xff]  ;;  %v1700_v20 = vadd.f32 %v542_v52, %v2512_v15  ;;  %v2514_v48 = vld [vmem:[#allocation58_spill] sm:$0xff] }
  0xa3   :  { %2495 = vst [vmem:[#allocation12_spill] sm:$0xff] %v1673_v3  ;;  %v1676_v25 = vadd.f32 %v534_v14, %v2496_v40  ;;  %v1688_v2 = vadd.f32 %v538_v47, %v2504_v18  ;;  %v2506_v62 = vld [vmem:[#allocation40_spill] sm:$0xff]  ;;  %v2510_v14 = vld [vmem:[#allocation53_spill] sm:$0xff]  ;;  %v1703_v38 = vadd.f32 %v543_v41, %v2514_v48  ;;  %v2516_v21 = vld [vmem:[#allocation59_spill] sm:$0xff] }
  0xa4   :  { %2491 = vst [vmem:[#allocation8_spill] sm:$0xff] %v1667_v29  ;;  %v1691_v45 = vadd.f32 %v539_v33, %v2506_v62  ;;  %v2508_v31 = vld [vmem:[#allocation44_spill] sm:$0xff]  ;;  %v1697_v49 = vadd.f32 %v541_v22, %v2510_v14  ;;  %v1706_v11 = vadd.f32 %v544_v59, %v2516_v21  ;;  %v2518_v47 = vld [vmem:[#allocation66_spill] sm:$0xff]  ;;  %v2520_v33 = vld [vmem:[#allocation67_spill] sm:$0xff] }
  0xa5   :  { %2497 = vst [vmem:[#allocation13_spill] sm:$0xff] %v1676_v25  ;;  %v1694_v60 = vadd.f32 %v540_v56, %v2508_v31  ;;  %v1709_v61 = vadd.f32 %v545_v58, %v2518_v47  ;;  %v1712_v28 = vadd.f32 %v546_v9, %v2520_v33  ;;  %v2522_v56 = vld [vmem:[#allocation68_spill] sm:$0xff]  ;;  %v2524_v22 = vld [vmem:[#allocation74_spill] sm:$0xff]  ;;  %v2526_v52 = vld [vmem:[#allocation75_spill] sm:$0xff] }
  0xa6   :  { %2499 = vst [vmem:[#allocation16_spill] sm:$0xff] %v1679_v13  ;;  %v1715_v16 = vadd.f32 %v547_v35, %v2522_v56  ;;  %v1718_v0 = vadd.f32 %v548_v19, %v2524_v22  ;;  %v1721_v40 = vadd.f32 %v549_v5, %v2526_v52  ;;  %v2528_v41 = vld [vmem:[#allocation76_spill] sm:$0xff]  ;;  %v2530_v59 = vld [vmem:[#allocation82_spill] sm:$0xff]  ;;  %v2534_v9 = vld [vmem:[#allocation91_spill] sm:$0xff] }
  0xa7   :  { %2501 = vst [vmem:[#allocation19_spill] sm:$0xff] %v1682_v30  ;;  %v1724_v54 = vadd.f32 %v550_v55, %v2528_v41  ;;  %v1727_v26 = vadd.f32 %v551_v39, %v2530_v59  ;;  %v2532_v58 = vld [vmem:[#allocation90_spill] sm:$0xff]  ;;  %v1733_v18 = vadd.f32 %v553_v46, %v2534_v9  ;;  %v2536_v35 = vld [vmem:[#allocation92_spill] sm:$0xff]  ;;  %v2538_v19 = vld [vmem:[#allocation93_spill] sm:$0xff] }
  0xa8   :  { %2503 = vst [vmem:[#allocation24_spill] sm:$0xff] %v1685_v63  ;;  %v1730_v12 = vadd.f32 %v552_v57, %v2532_v58  ;;  %v1736_v62 = vadd.f32 %v554_v34, %v2536_v35  ;;  %v1739_v31 = vadd.f32 %v555_v23, %v2538_v19  ;;  %v2540_v5 = vld [vmem:[#allocation94_spill] sm:$0xff]  ;;  %v2542_v55 = vld [vmem:[#allocation95_spill] sm:$0xff]  ;;  %v2544_v39 = vld [vmem:[#allocation96_spill] sm:$0xff] }
  0xa9   :  { %2505 = vst [vmem:[#allocation30_spill] sm:$0xff] %v1688_v2  ;;  %v1742_v14 = vadd.f32 %v556_v4, %v2540_v5  ;;  %v1745_v15 = vadd.f32 %v557_v32, %v2542_v55  ;;  %v1748_v48 = vadd.f32 %v558_v53, %v2544_v39  ;;  %v2546_v57 = vld [vmem:[#allocation97_spill] sm:$0xff]  ;;  %v2548_v46 = vld [vmem:[#allocation98_spill] sm:$0xff]  ;;  %v2550_v34 = vld [vmem:[#allocation99_spill] sm:$0xff] }
  0xaa   :  { %2507 = vst [vmem:[#allocation32_spill] sm:$0xff] %v1691_v45  ;;  %v1751_v21 = vadd.f32 %v559_v51, %v2546_v57  ;;  %v1754_v47 = vadd.f32 %v560_v24, %v2548_v46  ;;  %v1757_v33 = vadd.f32 %v561_v42, %v2550_v34  ;;  %v2552_v23 = vld [vmem:[#allocation100_spill] sm:$0xff]  ;;  %v2554_v4 = vld [vmem:[#allocation101_spill] sm:$0xff]  ;;  %v2556_v32 = vld [vmem:[#allocation102_spill] sm:$0xff] }
  0xab   :  { %2509 = vst [vmem:[#allocation38_spill] sm:$0xff] %v1694_v60  ;;  %v1760_v56 = vadd.f32 %v562_v37, %v2552_v23  ;;  %v1763_v22 = vadd.f32 %v563_v6, %v2554_v4  ;;  %v1766_v52 = vadd.f32 %v564_v17, %v2556_v32  ;;  %v2558_v53 = vld [vmem:[#allocation103_spill] sm:$0xff]  ;;  %v2560_v51 = vld [vmem:[#allocation104_spill] sm:$0xff]  ;;  %v2563_v9 = vld [vmem:[#allocation45_spill] sm:$0xff] }
  0xac   :  { %2511 = vst [vmem:[#allocation43_spill] sm:$0xff] %v1697_v49  ;;  %v1769_v41 = vadd.f32 %v565_v8, %v2558_v53  ;;  %v1772_v59 = vadd.f32 %v566_v27, %v2560_v51  ;;  %v2562_v24 = vld [vmem:[#allocation35_spill] sm:$0xff]  ;;  %v604_v42 = vmul.f32 2.0, %v2563_v9  ;;  %v2564_v35 = vld [vmem:[#allocation49_spill] sm:$0xff]  ;;  %v2565_v37 = vld [vmem:[#allocation60_spill] sm:$0xff] }
  0xad   :  { %2513 = vst [vmem:[#allocation50_spill] sm:$0xff] %v1700_v20  ;;  %v603_v58 = vmul.f32 2.0, %v2562_v24  ;;  %v605_v19 = vmul.f32 2.0, %v2564_v35  ;;  %v606_v5 = vmul.f32 2.0, %v2565_v37  ;;  %v2566_v55 = vld [vmem:[#allocation61_spill] sm:$0xff]  ;;  %v2570_v23 = vld [vmem:[#allocation106_spill] sm:$0xff] }
  0xae   :  { %2515 = vst [vmem:[#allocation55_spill] sm:$0xff] %v1703_v38  ;;  %v607_v6 = vmul.f32 2.0, %v2566_v55  ;;  %v2567_v39 = vld [vmem:[#allocation69_spill] sm:$0xff]  ;;  %v611_v4 = vmul.f32 2.0, %v2570_v23  ;;  %v2571_v27 = vld [vmem:[#allocation107_spill] sm:$0xff]  ;;  %v2584_v20 = vld [vmem:[#allocation120_spill] sm:$0xff] }
  0xaf   :  { %2517 = vst [vmem:[#allocation62_spill] sm:$0xff] %v1706_v11  ;;  %v608_v57 = vmul.f32 2.0, %v2567_v39  ;;  %v2568_v17 = vld [vmem:[#allocation77_spill] sm:$0xff]  ;;  %v612_v32 = vmul.f32 2.0, %v2571_v27  ;;  %v2583_v11 = vld [vmem:[#allocation119_spill] sm:$0xff]  ;;  %v625_v49 = vmul.f32 2.0, %v2584_v20  ;;  %v2594_v20 = vsub.f32 %v2429_v1, %v2490_v10 }
  0xb0   :  { %2519 = vst [vmem:[#allocation65_spill] sm:$0xff] %v1709_v61  ;;  %v609_v46 = vmul.f32 2.0, %v2568_v17  ;;  %v2569_v34 = vld [vmem:[#allocation105_spill] sm:$0xff]  ;;  %v624_v38 = vmul.f32 2.0, %v2583_v11  ;;  %v2586_v25 = vld [vmem:[#allocation122_spill] sm:$0xff]  ;;  %v2587_v3 = vld [vmem:[#allocation123_spill] sm:$0xff] }
  0xb1   :  { %2521 = vst [vmem:[#allocation72_spill] sm:$0xff] %v1712_v28  ;;  %v610_v8 = vmul.f32 2.0, %v2569_v34  ;;  %v2582_v28 = vld [vmem:[#allocation118_spill] sm:$0xff]  ;;  %v2585_v60 = vld [vmem:[#allocation121_spill] sm:$0xff]  ;;  %v627_v2 = vmul.f32 2.0, %v2586_v25  ;;  %v628_v63 = vmul.f32 2.0, %v2587_v3  ;;  %v2595_v25 = vsub.f32 %v2430_v7, %v2492_v43 }
  0xb2   :  { %2523 = vst [vmem:[#allocation79_spill] sm:$0xff] %v1715_v16  ;;  %v623_v61 = vmul.f32 2.0, %v2582_v28  ;;  %v626_v45 = vmul.f32 2.0, %v2585_v60  ;;  %v2588_v44 = vld [vmem:[#allocation124_spill] sm:$0xff]  ;;  %v2589_v29 = vld [vmem:[#allocation125_spill] sm:$0xff]  ;;  %v2590_v51 = vld [vmem:[#allocation126_spill] sm:$0xff]  ;;  %v635_v60 = vadd.f32 %v603_v58, %v2594_v20  ;;  %v644_v1 = vadd.f32 %v612_v32, %v2569_v34 }
  0xb3   :  { %2525 = vst [vmem:[#allocation83_spill] sm:$0xff] %v1718_v0  ;;  %v2581_v0 = vld [vmem:[#allocation117_spill] sm:$0xff]  ;;  %v629_v30 = vmul.f32 2.0, %v2588_v44  ;;  %v630_v13 = vmul.f32 2.0, %v2589_v29  ;;  %v631_v50 = vmul.f32 2.0, %v2590_v51  ;;  %v2591_v53 = vld [vmem:[#allocation127_spill] sm:$0xff]  ;;  %v636_v3 = vadd.f32 %v604_v42, %v2595_v25 }
  0xb4   :  { %2527 = vst [vmem:[#allocation86_spill] sm:$0xff] %v1721_v40  ;;  %v622_v16 = vmul.f32 2.0, %v2581_v0  ;;  %v632_v36 = vmul.f32 2.0, %v2591_v53  ;;  %v2592_v0 = vld [vmem:[#allocation128_spill] sm:$0xff]  ;;  %v637_v44 = vadd.f32 %v605_v19, %v2562_v24  ;;  %v638_v29 = vadd.f32 %v606_v5, %v2563_v9  ;;  %v2596_v19 = vld [vmem:[#allocation115_spill] sm:$0xff]  ;;  %v2602_v32 = vld [vmem:[#allocation121_spill] sm:$0xff] }
  0xb5   :  { %2529 = vst [vmem:[#allocation89_spill] sm:$0xff] %v1724_v54  ;;  %v2580_v54 = vld [vmem:[#allocation116_spill] sm:$0xff]  ;;  %v633_v28 = vmul.f32 2.0, %v2592_v0  ;;  %v639_v51 = vadd.f32 %v607_v6, %v2564_v35  ;;  %v640_v53 = vadd.f32 %v608_v57, %v2565_v37  ;;  %v641_v0 = vadd.f32 %v609_v46, %v2566_v55  ;;  %v2598_v57 = vld [vmem:[#allocation117_spill] sm:$0xff]  ;;  %v2599_v46 = vld [vmem:[#allocation118_spill] sm:$0xff] }
  0xb6   :  { %2531 = vst [vmem:[#allocation10_spill] sm:$0xff] %v1727_v26  ;;  %v621_v40 = vmul.f32 2.0, %v2580_v54  ;;  %v2593_v54 = vld [vmem:[#allocation129_spill] sm:$0xff]  ;;  %v654_v5 = vadd.f32 %v622_v16, %v2596_v19  ;;  %v2597_v6 = vld [vmem:[#allocation116_spill] sm:$0xff]  ;;  %v2607_v19 = vld [vmem:[#allocation126_spill] sm:$0xff] }
  0xb7   :  { %2533 = vst [vmem:[#allocation11_spill] sm:$0xff] %v1730_v12  ;;  %v2579_v12 = vld [vmem:[#allocation115_spill] sm:$0xff]  ;;  %v634_v11 = vmul.f32 2.0, %v2593_v54  ;;  %v642_v54 = vadd.f32 %v610_v8, %v2567_v39 }
  0xb8   :  { %2535 = vst [vmem:[#allocation14_spill] sm:$0xff] %v1733_v18  ;;  %v620_v26 = vmul.f32 2.0, %v2579_v12  ;;  %v643_v12 = vadd.f32 %v611_v4, %v2568_v17  ;;  %v2600_v8 = vld [vmem:[#allocation119_spill] sm:$0xff]  ;;  %v2601_v4 = vld [vmem:[#allocation120_spill] sm:$0xff] }
  0xb9   :  { %2537 = vst [vmem:[#allocation15_spill] sm:$0xff] %v1736_v62  ;;  %v2578_v62 = vld [vmem:[#allocation114_spill] sm:$0xff] }
  0xba   :  { %2539 = vst [vmem:[#allocation17_spill] sm:$0xff] %v1739_v31  ;;  %v619_v18 = vmul.f32 2.0, %v2578_v62  ;;  %v653_v42 = vadd.f32 %v621_v40, %v2578_v62  ;;  %v2606_v62 = vld [vmem:[#allocation125_spill] sm:$0xff] }
  0xbb   :  { %2541 = vst [vmem:[#allocation18_spill] sm:$0xff] %v1742_v14  ;;  %v2577_v14 = vld [vmem:[#allocation113_spill] sm:$0xff]  ;;  %v664_v16 = vadd.f32 %v632_v36, %v2606_v62  ;;  %v1853_v36 = vadd.f32 %v641_v0, %v2570_v23 }
  0xbc   :  { %2543 = vst [vmem:[#allocation21_spill] sm:$0xff] %v1745_v15  ;;  %v618_v31 = vmul.f32 2.0, %v2577_v14  ;;  %v652_v9 = vadd.f32 %v620_v26, %v2577_v14  ;;  %v2605_v14 = vld [vmem:[#allocation124_spill] sm:$0xff]  ;;  %v2611_v0 = vld [vmem:[#allocation113_spill] sm:$0xff] }
  0xbd   :  { %2545 = vst [vmem:[#allocation22_spill] sm:$0xff] %v1748_v48  ;;  %v2576_v48 = vld [vmem:[#allocation112_spill] sm:$0xff]  ;;  %v663_v40 = vadd.f32 %v631_v50, %v2605_v14  ;;  %v1856_v50 = vadd.f32 %v642_v54, %v2571_v27  ;;  %v2612_v54 = vld [vmem:[#allocation114_spill] sm:$0xff] }
  0xbe   :  { %2547 = vst [vmem:[#allocation26_spill] sm:$0xff] %v1751_v21  ;;  %v617_v15 = vmul.f32 2.0, %v2576_v48  ;;  %v651_v58 = vadd.f32 %v619_v18, %v2576_v48  ;;  %v2604_v48 = vld [vmem:[#allocation123_spill] sm:$0xff] }
  0xbf   :  { %2549 = vst [vmem:[#allocation27_spill] sm:$0xff] %v1754_v47  ;;  %v2575_v47 = vld [vmem:[#allocation111_spill] sm:$0xff]  ;;  %v662_v26 = vadd.f32 %v630_v13, %v2604_v48  ;;  %v1850_v13 = vadd.f32 %v640_v53, %v2569_v34 }
  0xc0   :  { %2551 = vst [vmem:[#allocation31_spill] sm:$0xff] %v1757_v33  ;;  %v616_v21 = vmul.f32 2.0, %v2575_v47  ;;  %v650_v24 = vadd.f32 %v618_v31, %v2575_v47  ;;  %v660_v31 = vadd.f32 %v628_v63, %v2602_v32  ;;  %v2603_v47 = vld [vmem:[#allocation122_spill] sm:$0xff]  ;;  %v670_v63 = vadd.f32 %v638_v29, %v2567_v39 }
  0xc1   :  { %2553 = vst [vmem:[#allocation36_spill] sm:$0xff] %v1760_v56  ;;  %v2574_v56 = vld [vmem:[#allocation110_spill] sm:$0xff]  ;;  %v661_v18 = vadd.f32 %v629_v30, %v2603_v47  ;;  %v1847_v30 = vadd.f32 %v639_v51, %v2568_v17  ;;  %v1892_v39 = vadd.f32 %v654_v5, %v2600_v8 }
  0xc2   :  { %2555 = vst [vmem:[#allocation37_spill] sm:$0xff] %v1763_v22  ;;  %v615_v33 = vmul.f32 2.0, %v2574_v56  ;;  %v649_v20 = vadd.f32 %v617_v15, %v2574_v56  ;;  %v659_v15 = vadd.f32 %v627_v2, %v2601_v4  ;;  %v669_v2 = vadd.f32 %v637_v44, %v2566_v55  ;;  %v2609_v44 = vld [vmem:[#allocation111_spill] sm:$0xff] }
  0xc3   :  { %2557 = vst [vmem:[#allocation41_spill] sm:$0xff] %v1766_v52  ;;  %v2573_v52 = vld [vmem:[#allocation109_spill] sm:$0xff]  ;;  %v1889_v55 = vadd.f32 %v653_v42, %v2599_v46  ;;  %v2628_v42 = vld [vmem:[#allocation88_spill] sm:$0xff] }
  0xc4   :  { %2559 = vst [vmem:[#allocation42_spill] sm:$0xff] %v1769_v41  ;;  %v614_v22 = vmul.f32 2.0, %v2573_v52  ;;  %v648_v25 = vadd.f32 %v616_v21, %v2573_v52  ;;  %v658_v21 = vadd.f32 %v626_v45, %v2600_v8  ;;  %v668_v45 = vadd.f32 %v636_v3, %v2565_v37  ;;  %v2636_v8 = vld [vmem:[#allocation24_spill] sm:$0xff] }
  0xc5   :  { %2561 = vst [vmem:[#allocation46_spill] sm:$0xff] %v1772_v59  ;;  %v2572_v59 = vld [vmem:[#allocation108_spill] sm:$0xff]  ;;  %v1862_v3 = vadd.f32 %v644_v1, %v2573_v52  ;;  %v1907_v1 = vadd.f32 %v659_v15, %v2605_v14  ;;  %v2638_v15 = vld [vmem:[#allocation30_spill] sm:$0xff] }
  0xc6   :  { %v613_v41 = vmul.f32 2.0, %v2572_v59  ;;  %v646_v7 = vadd.f32 %v614_v22, %v2571_v27  ;;  %v647_v43 = vadd.f32 %v615_v33, %v2572_v59  ;;  %v656_v22 = vadd.f32 %v624_v38, %v2598_v57  ;;  %v2614_v52 = vld [vmem:[#allocation116_spill] sm:$0xff] }
  0xc7   :  { %v657_v33 = vadd.f32 %v625_v49, %v2599_v46  ;;  %v667_v49 = vadd.f32 %v635_v60, %v2564_v35  ;;  %v1859_v60 = vadd.f32 %v643_v12, %v2572_v59  ;;  %v1874_v51 = vadd.f32 %v648_v25, %v2611_v0  ;;  %v2613_v12 = vld [vmem:[#allocation115_spill] sm:$0xff]  ;;  %2616 = vst [vmem:[#allocation48_spill] sm:$0xff] %v1907_v1  ;;  %v2620_v25 = vld [vmem:[#allocation128_spill] sm:$0xff]  ;;  %v2635_v46 = vld [vmem:[#allocation9_spill] sm:$0xff] }
  0xc8   :  { %v645_v10 = vadd.f32 %v613_v41, %v2570_v23  ;;  %v655_v41 = vadd.f32 %v623_v61, %v2597_v6  ;;  %v665_v61 = vadd.f32 %v633_v28, %v2607_v19  ;;  %v2608_v6 = vld [vmem:[#allocation127_spill] sm:$0xff]  ;;  %v2610_v28 = vld [vmem:[#allocation112_spill] sm:$0xff]  ;;  %v1877_v35 = vadd.f32 %v649_v20, %v2612_v54 }
  0xc9   :  { %v666_v38 = vadd.f32 %v634_v11, %v2608_v6  ;;  %v1868_v11 = vadd.f32 %v646_v7, %v2609_v44  ;;  %v1871_v53 = vadd.f32 %v647_v43, %v2610_v28  ;;  %v1880_v59 = vadd.f32 %v650_v24, %v2613_v12  ;;  %v2643_v44 = vld [vmem:[#allocation50_spill] sm:$0xff]  ;;  %v2644_v0 = vld [vmem:[#allocation55_spill] sm:$0xff] }
  0xca   :  { %v1865_v29 = vadd.f32 %v645_v10, %v2574_v56  ;;  %v1883_v37 = vadd.f32 %v651_v58, %v2614_v52  ;;  %v1886_v56 = vadd.f32 %v652_v9, %v2598_v57  ;;  %v1895_v17 = vadd.f32 %v655_v41, %v2601_v4  ;;  %v2625_v58 = vld [vmem:[#allocation103_spill] sm:$0xff]  ;;  %v2633_v57 = vld [vmem:[#allocation8_spill] sm:$0xff]  ;;  %v2645_v12 = vld [vmem:[#allocation62_spill] sm:$0xff] }
  0xcb   :  { %v1898_v34 = vadd.f32 %v656_v22, %v2602_v32  ;;  %v1901_v23 = vadd.f32 %v657_v33, %v2603_v47  ;;  %v1904_v27 = vadd.f32 %v658_v21, %v2604_v48  ;;  %v1910_v10 = vadd.f32 %v660_v31, %v2606_v62  ;;  %v2622_v47 = vld [vmem:[#allocation129_spill] sm:$0xff]  ;;  %v2624_v48 = vld [vmem:[#allocation87_spill] sm:$0xff]  ;;  %v2629_v62 = vld [vmem:[#allocation104_spill] sm:$0xff] }
  0xcc   :  { %v1913_v7 = vadd.f32 %v661_v18, %v2607_v19  ;;  %v1916_v43 = vadd.f32 %v662_v26, %v2608_v6  ;;  %v1919_v20 = vadd.f32 %v663_v40, %v2620_v25  ;;  %v1922_v24 = vadd.f32 %v664_v16, %v2622_v47  ;;  %v2632_v19 = vld [vmem:[#allocation16_spill] sm:$0xff]  ;;  %v2634_v22 = vld [vmem:[#allocation19_spill] sm:$0xff]  ;;  %v2639_v32 = vld [vmem:[#allocation13_spill] sm:$0xff] }
  0xcd   :  { %2615 = vst [vmem:[#allocation47_spill] sm:$0xff] %v1904_v27  ;;  %v2626_v9 = vsub.f32 %v2624_v48, %v2625_v58  ;;  %v2630_v5 = vsub.f32 %v2628_v42, %v2629_v62  ;;  %v699_v6 = vsub.f32 %v2633_v57, %v2632_v19  ;;  %v700_v33 = vsub.f32 %v2635_v46, %v2634_v22  ;;  %v2637_v21 = vld [vmem:[#allocation12_spill] sm:$0xff]  ;;  %v2641_v40 = vld [vmem:[#allocation38_spill] sm:$0xff]  ;;  %v2646_v25 = vld [vmem:[#allocation65_spill] sm:$0xff] }
  0xce   :  { %2617 = vst [vmem:[#allocation51_spill] sm:$0xff] %v1910_v10  ;;  %v701_v4 = vsub.f32 %v2637_v21, %v2636_v8  ;;  %v702_v31 = vsub.f32 %v2639_v32, %v2638_v15  ;;  %v2640_v18 = vld [vmem:[#allocation32_spill] sm:$0xff]  ;;  %v704_v16 = vsub.f32 %v2634_v22, %v2641_v40  ;;  %v706_v28 = vsub.f32 %v2638_v15, %v2643_v44  ;;  %v2649_v62 = vld [vmem:[#allocation83_spill] sm:$0xff]  ;;  %v2651_v22 = vld [vmem:[#allocation89_spill] sm:$0xff] }
  0xcf   :  { %2618 = vst [vmem:[#allocation52_spill] sm:$0xff] %v1913_v7  ;;  %v1927_v14 = vadd.f32 %v665_v61, %v2626_v9  ;;  %v1932_v41 = vadd.f32 %v666_v38, %v2630_v5  ;;  %v703_v26 = vsub.f32 %v2632_v19, %v2640_v18  ;;  %v2642_v61 = vld [vmem:[#allocation43_spill] sm:$0xff]  ;;  %v707_v54 = vsub.f32 %v2640_v18, %v2644_v0  ;;  %v2647_v48 = vld [vmem:[#allocation72_spill] sm:$0xff]  ;;  %v2650_v19 = vld [vmem:[#allocation86_spill] sm:$0xff] }
  0xd0   :  { %2619 = vst [vmem:[#allocation56_spill] sm:$0xff] %v1916_v43  ;;  %v705_v38 = vsub.f32 %v2636_v8, %v2642_v61  ;;  %v708_v52 = vsub.f32 %v2641_v40, %v2645_v12  ;;  %v709_v47 = vsub.f32 %v2642_v61, %v2646_v25  ;;  %v710_v58 = vsub.f32 %v2643_v44, %v2647_v48  ;;  %v2648_v9 = vld [vmem:[#allocation79_spill] sm:$0xff]  ;;  %v2652_v8 = vld [vmem:[#allocation10_spill] sm:$0xff] }
  0xd1   :  { %2621 = vst [vmem:[#allocation57_spill] sm:$0xff] %v1919_v20  ;;  %v711_v42 = vsub.f32 %v2644_v0, %v2648_v9  ;;  %v712_v5 = vsub.f32 %v2645_v12, %v2649_v62  ;;  %v713_v57 = vsub.f32 %v2646_v25, %v2650_v19  ;;  %v714_v46 = vsub.f32 %v2647_v48, %v2651_v22  ;;  %v2653_v15 = vld [vmem:[#allocation11_spill] sm:$0xff]  ;;  %v2654_v18 = vld [vmem:[#allocation14_spill] sm:$0xff]  ;;  %v2656_v0 = vld [vmem:[#allocation17_spill] sm:$0xff] }
  0xd2   :  { %2623 = vst [vmem:[#allocation63_spill] sm:$0xff] %v1922_v24  ;;  %v1968_v21 = vsub.f32 %v2648_v9, %v2652_v8  ;;  %v1972_v32 = vsub.f32 %v2649_v62, %v2653_v15  ;;  %v1976_v40 = vsub.f32 %v2650_v19, %v2654_v18  ;;  %v2655_v61 = vld [vmem:[#allocation15_spill] sm:$0xff]  ;;  %v1984_v12 = vsub.f32 %v2652_v8, %v2656_v0  ;;  %v2657_v25 = vld [vmem:[#allocation18_spill] sm:$0xff]  ;;  %v2658_v9 = vld [vmem:[#allocation21_spill] sm:$0xff] }
  0xd3   :  { %2627 = vst [vmem:[#allocation64_spill] sm:$0xff] %v1927_v14  ;;  %v1980_v44 = vsub.f32 %v2651_v22, %v2655_v61  ;;  %v1988_v48 = vsub.f32 %v2653_v15, %v2657_v25  ;;  %v1992_v62 = vsub.f32 %v2654_v18, %v2658_v9  ;;  %v2662_v14 = vld [vmem:[#allocation26_spill] sm:$0xff]  ;;  %v2664_v24 = vld [vmem:[#allocation27_spill] sm:$0xff]  ;;  %v731_v20 = vmul.f32 %v667_v49, %v667_v49  ;;  %v2669_v49 = vld [vmem:[#allocation41_spill] sm:$0xff] }
  0xd4   :  { %2631 = vst [vmem:[#allocation70_spill] sm:$0xff] %v1932_v41  ;;  %v2660_v41 = vld [vmem:[#allocation22_spill] sm:$0xff]  ;;  %v2000_v22 = vsub.f32 %v2656_v0, %v2662_v14  ;;  %v2004_v8 = vsub.f32 %v2657_v25, %v2664_v24  ;;  %v732_v43 = vmul.f32 %v668_v45, %v668_v45  ;;  %v733_v15 = vmul.f32 %v669_v2, %v669_v2  ;;  %v2665_v27 = vld [vmem:[#allocation31_spill] sm:$0xff] }
  0xd5   :  { %2659 = vst [vmem:[#allocation71_spill] sm:$0xff] %v1992_v62  ;;  %v1996_v19 = vsub.f32 %v2655_v61, %v2660_v41  ;;  %v734_v7 = vmul.f32 %v670_v63, %v670_v63  ;;  %v763_v10 = vmul.f32 %v699_v6, %v699_v6  ;;  %v764_v1 = vmul.f32 %v700_v33, %v700_v33 }
  0xd6   :  { %2663 = vst [vmem:[#allocation78_spill] sm:$0xff] %v2000_v22  ;;  %v765_v18 = vmul.f32 %v701_v4, %v701_v4  ;;  %v766_v62 = vmul.f32 %v702_v31, %v702_v31  ;;  %v2008_v61 = vsub.f32 %v2658_v9, %v2665_v27  ;;  %v2667_v22 = vld [vmem:[#allocation37_spill] sm:$0xff]  ;;  %v2020_v45 = vsub.f32 %v2664_v24, %v2669_v49 }
  0xd7   :  { %2661 = vst [vmem:[#allocation73_spill] sm:$0xff] %v1996_v19  ;;  %v2666_v19 = vld [vmem:[#allocation36_spill] sm:$0xff]  ;;  %v2016_v25 = vsub.f32 %v2662_v14, %v2667_v22  ;;  %v735_v2 = vmul.f32 %v1847_v30, %v1847_v30  ;;  %v736_v63 = vmul.f32 %v1850_v13, %v1850_v13  ;;  %v767_v6 = vmul.f32 %v703_v26, %v703_v26 }
  0xd8   :  { %v2012_v0 = vsub.f32 %v2660_v41, %v2666_v19  ;;  %2670 = vst [vmem:[#allocation81_spill] sm:$0xff] %v2020_v45  ;;  %v768_v33 = vmul.f32 %v704_v16, %v704_v16  ;;  %v737_v41 = vmul.f32 %v1853_v36, %v1853_v36  ;;  %v738_v4 = vmul.f32 %v1856_v50, %v1856_v50  ;;  %v2671_v45 = vld [vmem:[#allocation42_spill] sm:$0xff] }
  0xd9   :  { %2668 = vst [vmem:[#allocation80_spill] sm:$0xff] %v2016_v25  ;;  %v769_v14 = vmul.f32 %v705_v38, %v705_v38  ;;  %v770_v31 = vmul.f32 %v706_v28, %v706_v28  ;;  %v795_v9 = vadd.f32 %v763_v10, %v731_v20  ;;  %v796_v22 = vadd.f32 %v764_v1, %v732_v43  ;;  %v2672_v25 = vld [vmem:[#allocation46_spill] sm:$0xff] }
  0xda   :  { %v797_v24 = vadd.f32 %v765_v18, %v733_v15  ;;  %v798_v49 = vadd.f32 %v766_v62, %v734_v7  ;;  %v2032_v30 = vsub.f32 %v2665_v27, %v2671_v45  ;;  %v2036_v13 = vsub.f32 %v2666_v19, %v2672_v25 }
  0xdb   :  { %v739_v36 = vmul.f32 %v1859_v60, %v1859_v60  ;;  %v740_v50 = vmul.f32 %v1862_v3, %v1862_v3  ;;  %v771_v26 = vmul.f32 %v707_v54, %v707_v54  ;;  %v772_v16 = vmul.f32 %v708_v52, %v708_v52 }
  0xdc   :  { %v799_v10 = vadd.f32 %v767_v6, %v735_v2  ;;  %v800_v1 = vadd.f32 %v768_v33, %v736_v63  ;;  %v741_v7 = vmul.f32 %v1865_v29, %v1865_v29  ;;  %v742_v27 = vmul.f32 %v1868_v11, %v1868_v11 }
  0xdd   :  { %v773_v43 = vmul.f32 %v709_v47, %v709_v47  ;;  %v774_v20 = vmul.f32 %v710_v58, %v710_v58  ;;  %v801_v38 = vadd.f32 %v769_v14, %v737_v41  ;;  %v802_v28 = vadd.f32 %v770_v31, %v738_v4 }
  0xde   :  { %v827_v62 = vadd.f32 %v797_v24, %v795_v9  ;;  %v842_v19 = vadd.f32 %v798_v49, %v796_v22  ;;  %v743_v60 = vmul.f32 %v1871_v53, %v1871_v53  ;;  %v744_v3 = vmul.f32 %v1874_v51, %v1874_v51 }
  0xdf   :  { %v775_v54 = vmul.f32 %v711_v42, %v711_v42  ;;  %v776_v52 = vmul.f32 %v712_v5, %v712_v5  ;;  %v803_v15 = vadd.f32 %v771_v26, %v739_v36  ;;  %v804_v18 = vadd.f32 %v772_v16, %v740_v50  ;;  %v2673_v50 = vld [vmem:[#allocation47_spill] sm:$0xff] }
  0xe0   :  { %v828_v29 = vadd.f32 %v827_v62, %v799_v10  ;;  %v843_v25 = vadd.f32 %v842_v19, %v800_v1  ;;  %v745_v11 = vmul.f32 %v1877_v35, %v1877_v35  ;;  %v746_v47 = vmul.f32 %v1880_v59, %v1880_v59 }
  0xe1   :  { %v777_v58 = vmul.f32 %v713_v57, %v713_v57  ;;  %v778_v45 = vmul.f32 %v714_v46, %v714_v46  ;;  %v805_v2 = vadd.f32 %v773_v43, %v741_v7  ;;  %v806_v63 = vadd.f32 %v774_v20, %v742_v27  ;;  %v2676_v27 = vld [vmem:[#allocation48_spill] sm:$0xff]  ;;  %v2677_v20 = vld [vmem:[#allocation51_spill] sm:$0xff] }
  0xe2   :  { %v829_v53 = vadd.f32 %v828_v29, %v801_v38  ;;  %v844_v6 = vadd.f32 %v843_v25, %v802_v28  ;;  %v747_v51 = vmul.f32 %v1883_v37, %v1883_v37  ;;  %v748_v42 = vmul.f32 %v1886_v56, %v1886_v56 }
  0xe3   :  { %v779_v5 = vmul.f32 %v1968_v21, %v1968_v21  ;;  %v780_v35 = vmul.f32 %v1972_v32, %v1972_v32  ;;  %v807_v33 = vadd.f32 %v775_v54, %v743_v60  ;;  %v808_v59 = vadd.f32 %v776_v52, %v744_v3  ;;  %v2679_v52 = vld [vmem:[#allocation52_spill] sm:$0xff] }
  0xe4   :  { %v830_v57 = vadd.f32 %v829_v53, %v803_v15  ;;  %v845_v46 = vadd.f32 %v844_v6, %v804_v18  ;;  %v749_v41 = vmul.f32 %v1889_v55, %v1889_v55  ;;  %v750_v4 = vmul.f32 %v1892_v39, %v1892_v39  ;;  %v2680_v18 = vld [vmem:[#allocation56_spill] sm:$0xff]  ;;  %v2682_v53 = vld [vmem:[#allocation63_spill] sm:$0xff] }
  0xe5   :  { %v781_v37 = vmul.f32 %v1976_v40, %v1976_v40  ;;  %v782_v56 = vmul.f32 %v1980_v44, %v1980_v44  ;;  %v809_v21 = vadd.f32 %v777_v58, %v745_v11  ;;  %v810_v14 = vadd.f32 %v778_v45, %v746_v47 }
  0xe6   :  { %v831_v31 = vadd.f32 %v830_v57, %v805_v2  ;;  %v846_v32 = vadd.f32 %v845_v46, %v806_v63  ;;  %v751_v9 = vmul.f32 %v1895_v17, %v1895_v17  ;;  %v752_v22 = vmul.f32 %v1898_v34, %v1898_v34  ;;  %v2674_v17 = vld [vmem:[#allocation71_spill] sm:$0xff]  ;;  %v2675_v34 = vld [vmem:[#allocation73_spill] sm:$0xff]  ;;  %v2685_v57 = vld [vmem:[#allocation64_spill] sm:$0xff] }
  0xe7   :  { %v783_v55 = vmul.f32 %v1984_v12, %v1984_v12  ;;  %v784_v39 = vmul.f32 %v1988_v48, %v1988_v48  ;;  %v811_v40 = vadd.f32 %v779_v5, %v747_v51  ;;  %v812_v24 = vadd.f32 %v780_v35, %v748_v42  ;;  %v2681_v2 = vld [vmem:[#allocation57_spill] sm:$0xff]  ;;  %v2683_v51 = vld [vmem:[#allocation80_spill] sm:$0xff] }
  0xe8   :  { %v832_v49 = vadd.f32 %v831_v31, %v807_v33  ;;  %v847_v44 = vadd.f32 %v846_v32, %v808_v59  ;;  %v753_v36 = vmul.f32 %v1901_v23, %v1901_v23  ;;  %v754_v26 = vmul.f32 %v2673_v50, %v2673_v50  ;;  %v2678_v23 = vld [vmem:[#allocation78_spill] sm:$0xff]  ;;  %v2684_v5 = vld [vmem:[#allocation81_spill] sm:$0xff] }
  0xe9   :  { %v785_v16 = vmul.f32 %v2674_v17, %v2674_v17  ;;  %v786_v10 = vmul.f32 %v2675_v34, %v2675_v34  ;;  %v813_v12 = vadd.f32 %v781_v37, %v749_v41  ;;  %v814_v1 = vadd.f32 %v782_v56, %v750_v4  ;;  %v2686_v41 = vld [vmem:[#allocation70_spill] sm:$0xff] }
  0xea   :  { %v833_v7 = vadd.f32 %v832_v49, %v809_v21  ;;  %v848_v48 = vadd.f32 %v847_v44, %v810_v14  ;;  %v755_v43 = vmul.f32 %v2676_v27, %v2676_v27  ;;  %v756_v38 = vmul.f32 %v2677_v20, %v2677_v20 }
  0xeb   :  { %v787_v28 = vmul.f32 %v2678_v23, %v2678_v23  ;;  %v788_v62 = vmul.f32 %v2004_v8, %v2004_v8  ;;  %v815_v19 = vadd.f32 %v783_v55, %v751_v9  ;;  %v816_v60 = vadd.f32 %v784_v39, %v752_v22 }
  0xec   :  { %v834_v3 = vadd.f32 %v833_v7, %v811_v40  ;;  %v849_v54 = vadd.f32 %v848_v48, %v812_v24  ;;  %v757_v15 = vmul.f32 %v2679_v52, %v2679_v52  ;;  %v758_v29 = vmul.f32 %v2680_v18, %v2680_v18 }
  0xed   :  { %v789_v25 = vmul.f32 %v2008_v61, %v2008_v61  ;;  %v790_v11 = vmul.f32 %v2012_v0, %v2012_v0  ;;  %v817_v47 = vadd.f32 %v785_v16, %v753_v36  ;;  %v818_v58 = vadd.f32 %v786_v10, %v754_v26 }
  0xee   :  { %v835_v45 = vadd.f32 %v834_v3, %v813_v12  ;;  %v850_v8 = vadd.f32 %v849_v54, %v814_v1  ;;  %v759_v63 = vmul.f32 %v2681_v2, %v2681_v2  ;;  %v760_v6 = vmul.f32 %v2682_v53, %v2682_v53 }
  0xef   :  { %v791_v42 = vmul.f32 %v2683_v51, %v2683_v51  ;;  %v792_v35 = vmul.f32 %v2684_v5, %v2684_v5  ;;  %v819_v61 = vadd.f32 %v787_v28, %v755_v43  ;;  %v820_v33 = vadd.f32 %v788_v62, %v756_v38 }
  0xf0   :  { %v836_v59 = vadd.f32 %v835_v45, %v815_v19  ;;  %v851_v0 = vadd.f32 %v850_v8, %v816_v60  ;;  %v761_v46 = vmul.f32 %v2685_v57, %v2685_v57  ;;  %v762_v4 = vmul.f32 %v2686_v41, %v2686_v41 }
  0xf1   :  { %v793_v37 = vmul.f32 %v2032_v30, %v2032_v30  ;;  %v794_v56 = vmul.f32 %v2036_v13, %v2036_v13  ;;  %v821_v21 = vadd.f32 %v789_v25, %v757_v15  ;;  %v822_v14 = vadd.f32 %v790_v11, %v758_v29 }
  0xf2   :  { %v837_v31 = vadd.f32 %v836_v59, %v817_v47  ;;  %v852_v32 = vadd.f32 %v851_v0, %v818_v58  ;;  %v823_v9 = vadd.f32 %v791_v42, %v759_v63  ;;  %v824_v22 = vadd.f32 %v792_v35, %v760_v6 }
  0xf3   :  { %v825_v40 = vadd.f32 %v793_v37, %v761_v46  ;;  %v826_v24 = vadd.f32 %v794_v56, %v762_v4 }
  0xf4   :  { %v838_v55 = vadd.f32 %v837_v31, %v819_v61  ;;  %v853_v39 = vadd.f32 %v852_v32, %v820_v33 }
  0xf6   :  { %v839_v49 = vadd.f32 %v838_v55, %v821_v21  ;;  %v854_v44 = vadd.f32 %v853_v39, %v822_v14 }
  0xf8   :  { %v840_v36 = vadd.f32 %v839_v49, %v823_v9  ;;  %v855_v50 = vadd.f32 %v854_v44, %v824_v22 }
  0xfa   :  { %v841_v30 = vadd.f32 %v840_v36, %v825_v40  ;;  %v856_v13 = vadd.f32 %v855_v50, %v826_v24 }
  0xfc   :  { %857 = vst [vmem:[#allocation5] sm:$0xff] %v841_v30 }
  0xfd   :  { %858 = vst [vmem:[#allocation5 + $0x8] sm:$0xff] %v856_v13 }
  0xfe   :  { %871 = dma.vmem_to_hbm [thread:$0]  %s864_s13, 256, %s866_s16, [#allocation4], %s935_s11, %s935_s11, %s936_s12  }
  0xff   :  { %932 = dma.done.wait [#allocation4], 256  }
 0x100   :  { %933 = vsyncadd [#allocation4], 4294967040 }
 0x101   :  { %876 = vsyncpa [#allocation3], 1 }
 0x102   :  { %877 = vsyncpa [#allocation4], 1 }

</bundles_post_ra>
